<compile_context>
chip_gen: v7x
topology: tpu7x:2x2x1
jax: 0.10.0
libtpu: 0.0.40
codegen_flags: <defaults>
</compile_context>

<pallas_src>
import functools

import jax
import jax.numpy as jnp
import numpy as np
from jax import lax
from jax.experimental import pallas as pl
from jax.experimental.pallas import tpu as pltpu


def _elu_p1(a):
    # F.elu(x, 1.0) + 1  ==  x + 1  (x > 0)  ;  exp(x)  (x <= 0)
    return jnp.where(a > 0, a + 1.0, jnp.exp(a))


def fast_ff_fused_kernel(x_ref, g_ref, bln_ref, wp_ref, wo_ref, o_ref, s_ref,
                         *, num_head, dim_head, mxu_dtype):
    # Per grid step (b, c):
    #   x_ref / o_ref : (C, in_dim)         lane-dense chunk of rows of batch b
    #   wp_ref        : (in_dim, 3*H*D+H)   fused slow_net weight (VMEM resident)
    #   wo_ref        : (H*D, in_dim)       out_linear weight
    #   s_ref         : (H, D, D) f32       fast-weight state carried across chunks
    H, D = num_head, dim_head
    HD = H * D
    C = x_ref.shape[0]
    chunk_idx = pl.program_id(1)

    @pl.when(chunk_idx == 0)
    def _():
        s_ref[...] = jnp.zeros_like(s_ref)

    # -------- LayerNorm (f32) + fused slow_net projection (one MXU matmul) ---
    x = x_ref[...]
    mu = jnp.mean(x, axis=-1, keepdims=True)
    xc = x - mu
    var = jnp.mean(xc * xc, axis=-1, keepdims=True)
    y = xc * lax.rsqrt(var + 1e-5) * g_ref[...] + bln_ref[...]

    proj = jnp.dot(y.astype(mxu_dtype), wp_ref[...],
                   preferred_element_type=jnp.float32)          # (C, 3*HD + H)

    # -------- head-batched q / k / v / beta as (H, C, D) ---------------------
    def heads(col0):
        return jnp.stack([proj[:, col0 + h * D: col0 + (h + 1) * D]
                          for h in range(H)], axis=0)           # (H, C, D)

    q = heads(0)
    k = heads(HD)
    v = heads(2 * HD)
    beta = jax.nn.sigmoid(
        jnp.stack([proj[:, 3 * HD + h: 3 * HD + h + 1] for h in range(H)],
                  axis=0))                                      # (H, C, 1)

    q = _elu_p1(q)
    q = q / jnp.sum(q, axis=-1, keepdims=True)
    k = _elu_p1(k)
    k = k / jnp.sum(k, axis=-1, keepdims=True)

    def bmm(a, b, ca, cb):
        # batch over axis 0 (heads), contract a-dim `ca` with b-dim `cb`
        return lax.dot_general(a, b, (((ca,), (cb,)), ((0,), (0,))),
                               preferred_element_type=jnp.float32)

    s0 = s_ref[...]                                             # (H, D, D) f32

    # rhs_t = beta_t * (v_t - k_t S0)                         (state path: f32)
    rhs = beta * (v - bmm(k, s0, 2, 1))                         # (H, C, D)

    # boolean triangular masks (applied via jnp.where, no f32 mask tensors)
    row = lax.broadcasted_iota(jnp.int32, (C, C), 0)
    col = lax.broadcasted_iota(jnp.int32, (C, C), 1)
    strict = (row > col)[None]                                  # (1, C, C)
    incl = (row >= col)[None]

    k_dt = k.astype(mxu_dtype)
    q_dt = q.astype(mxu_dtype)

    # T = -diag(beta) * strict_tril(K K^T)   (strictly lower-triangular => T^C = 0)
    a = bmm(k_dt, k_dt, 2, 2)                                   # (H, C, C)
    t_mat = jnp.where(strict, a, 0.0) * (-beta)

    # Blocked/doubling solve of (I + diag(beta) strict_tril(K K^T)) W = rhs:
    #   (I - T)^{-1} = prod_{i=0}^{m-1} (I + T^(2^i)),  m = ceil(log2(C)).
    # All matmuls are head-batched full-tile ops; f32 accumulation is kept on
    # this path because W feeds the carried state S.
    m = max(1, (C - 1).bit_length())
    w = rhs + bmm(t_mat, rhs, 2, 1)                             # (H, C, D)
    tp = t_mat
    for _ in range(1, m):
        tp = bmm(tp, tp, 2, 1)
        w = w + bmm(tp, w, 2, 1)

    # o_t = q_t S0 + sum_{s<=t} (q_t . k_s) w_s
    qk = jnp.where(incl, bmm(q_dt, k_dt, 2, 2), 0.0)            # (H, C, C)
    o_hcd = (bmm(q, s0, 2, 1)
             + bmm(qk.astype(mxu_dtype), w.astype(mxu_dtype), 2, 1))  # (H, C, D)

    # single state update per chunk:  S <- S0 + K^T W          (f32)
    s_ref[...] = s0 + bmm(k, w, 1, 1)                           # (H, D, D)

    # out_linear + residual.
    o_wide = jnp.concatenate([o_hcd[h] for h in range(H)], axis=-1)  # (C, HD)
    # TODO(synk): nn.Dropout treated as identity (eval mode); no RNG dropout.
    o_ref[...] = x + jnp.dot(o_wide.astype(mxu_dtype), wo_ref[...],
                             preferred_element_type=jnp.float32)


def fast_ff_layer(x, gamma, beta_ln, w_slow, w_out, *, num_head, dim_head,
                  chunk=128, mxu_dtype=jnp.bfloat16):
    """FastFFlayer forward.  x: (slen, bsz, in_dim) float32.

    chunk: sequence chunk length for the chunkwise-parallel delta rule
      (128 for v5e's 128-wide MXU; sweep {128, 256} on v6e/v7x); clipped to
      slen, must divide it.
    mxu_dtype: dtype of MXU operands (bf16 default; f32 for exact checks).
      State S, the doubling-solve accumulation, LayerNorm and the q/k
      normalisation always stay f32.
    """
    slen, bsz, in_dim = x.shape
    H, D = num_head, dim_head
    HD = H * D

    C = min(chunk, slen)
    # TODO(synk): pad the sequence when slen % C != 0 instead of asserting
    # (a partial last block must still be fully written: the output aliases x).
    assert slen % C == 0, "slen must be a multiple of the chunk size"
    assert C == slen or C % 8 == 0, "chunk must be a multiple of 8"
    n_chunks = slen // C

    # Fused projection weight: reorder slow_net columns from per-head
    # [q|k|v|beta] packing into grouped [q_all | k_all | v_all | beta_all].
    w = w_slow.reshape(in_dim, H, 3 * D + 1)
    wq = w[:, :, 0:D].reshape(in_dim, HD)
    wk = w[:, :, D:2 * D].reshape(in_dim, HD)
    wv = w[:, :, 2 * D:3 * D].reshape(in_dim, HD)
    wb = w[:, :, 3 * D]                                        # (in_dim, H)
    # Weights passed already in the MXU dtype -> half the weight VMEM / DMA.
    w_proj = jnp.concatenate([wq, wk, wv, wb], axis=1).astype(mxu_dtype)
    w_o = w_out.astype(mxu_dtype)

    # Batch-major layout so each (batch, chunk) grid step reads/writes a
    # contiguous lane-dense (C, in_dim) slab.
    x_b = jnp.transpose(x, (1, 0, 2)).astype(jnp.float32)
    g2 = gamma.reshape(1, in_dim)
    b2 = beta_ln.reshape(1, in_dim)

    m = max(1, (C - 1).bit_length())
    flops = bsz * n_chunks * (
        2 * C * in_dim * (3 * HD + H)                      # fused slow_net
        + 2 * C * HD * in_dim                              # out_linear
        + H * (3 * 2 * C * C * D)                          # K K^T, q K^T, qk@W
        + H * ((m - 1) * 2 * C * C * C + m * 2 * C * C * D)  # doubling solve
        + H * (3 * 2 * C * D * D))                         # S apply / update
    transcendentals = bsz * slen * H * (2 * D + 1)
    itemsize = jnp.dtype(mxu_dtype).itemsize
    bytes_accessed = (4 * 2 * bsz * slen * in_dim
                      + itemsize * (in_dim * (3 * HD + H) + HD * in_dim))

    row_spec = pl.BlockSpec((None, C, in_dim), lambda b, c: (b, c, 0))

    def full(shape):
        return pl.BlockSpec(shape, lambda b, c: (0,) * len(shape))

    kernel = functools.partial(fast_ff_fused_kernel, num_head=H, dim_head=D,
                               mxu_dtype=mxu_dtype)

    out_b = pl.pallas_call(
        kernel,
        out_shape=jax.ShapeDtypeStruct((bsz, slen, in_dim), jnp.float32),
        grid=(bsz, n_chunks),
        in_specs=[
            row_spec,                               # x (batch-major, residual)
            full((1, in_dim)),                      # LN gamma
            full((1, in_dim)),                      # LN beta
            full((in_dim, 3 * HD + H)),             # fused slow_net weight
            full((HD, in_dim)),                     # out_linear weight
        ],
        out_specs=row_spec,
        scratch_shapes=[
            pltpu.VMEM((H, D, D), jnp.float32),     # fast-weight state S (carried)
        ],
        input_output_aliases={0: 0},                # residual x aliases the output
        compiler_params=pltpu.CompilerParams(
            dimension_semantics=("parallel", "arbitrary"),
            vmem_limit_bytes=32 * 1024 * 1024),
        cost_estimate=pl.CostEstimate(flops=flops,
                                      transcendentals=transcendentals,
                                      bytes_accessed=bytes_accessed),
    )(x_b, g2, b2, w_proj, w_o)

    return jnp.transpose(out_b, (1, 0, 2))                     # (slen, bsz, in_dim)


# ------------------------- pure-JAX reference check --------------------------
def reference_forward(x, gamma, beta_ln, w_slow, w_out, *, num_head, dim_head):
    slen, bsz, in_dim = x.shape
    mu = jnp.mean(x, -1, keepdims=True)
    var = jnp.mean((x - mu) ** 2, -1, keepdims=True)
    y = (x - mu) / jnp.sqrt(var + 1e-5) * gamma + beta_ln
    qkvb = (y @ w_slow).reshape(slen, bsz, num_head, 3 * dim_head + 1)
    q, k, v, b = jnp.split(qkvb, [dim_head, 2 * dim_head, 3 * dim_head], axis=-1)
    b = jax.nn.sigmoid(b)
    perm = lambda a: jnp.transpose(a, (1, 2, 0, 3))
    q, k, v, b = map(perm, (q, k, v, b))
    elu_p1 = lambda a: jnp.where(a > 0, a + 1.0, jnp.exp(a))
    sn = lambda a: a / jnp.sum(a, -1, keepdims=True)
    q = sn(elu_p1(q))
    k = sn(elu_p1(k))
    qT, kT, vT, bT = (jnp.transpose(a, (2, 0, 1, 3)) for a in (q, k, v, b))

    def step(S, inp):
        q_t, k_t, v_t, b_t = inp
        v_old = jnp.einsum('bhed,bhe->bhd', S, k_t)
        delta = b_t * (v_t - v_old)
        S = S + jnp.einsum('bhe,bhd->bhed', k_t, delta)
        out_t = jnp.einsum('bhed,bhe->bhd', S, q_t)
        return S, out_t

    S0 = jnp.zeros((bsz, num_head, dim_head, dim_head), jnp.float32)
    _, outs = lax.scan(step, S0, (qT, kT, vT, bT))              # (L, B, H, D)
    out = jnp.transpose(outs, (1, 0, 2, 3)).reshape(bsz, slen,
                                                    num_head * dim_head)
    out = jnp.transpose(out, (1, 0, 2))                         # (L, B, H*D)
    return x + out @ w_out


if __name__ == "__main__":
    num_head, dim_head = 4, 8
    proj_dim = num_head * (3 * dim_head + 1)
    key0, key1 = jax.random.split(jax.random.PRNGKey(0), 2)

    def make_inputs(key, slen, bsz, in_dim):
        kx, kw1, kw2 = jax.random.split(key, 3)
        x = jax.random.normal(kx, (slen, bsz, in_dim), jnp.float32)
        gamma = jnp.ones((in_dim,), jnp.float32)       # LayerNorm default init
        beta_ln = jnp.zeros((in_dim,), jnp.float32)
        w_slow = jax.random.normal(kw1, (in_dim, proj_dim), jnp.float32) \
            * (1.0 / jnp.sqrt(in_dim))
        w_out = jax.random.normal(kw2, (num_head * dim_head, in_dim),
                                  jnp.float32) \
            * (1.0 / jnp.sqrt(num_head * dim_head))
        return x, gamma, beta_ln, w_slow, w_out

    # Case 1: single chunk (C == slen), exact f32 MXU path -> tight tolerance.
    slen, bsz, in_dim = 8, 2, 32
    args = make_inputs(key0, slen, bsz, in_dim)
    out = fast_ff_layer(*args, num_head=num_head, dim_head=dim_head,
                        mxu_dtype=jnp.float32)
    out = jax.block_until_ready(out)
    ref = reference_forward(*args, num_head=num_head, dim_head=dim_head)
    assert out.shape == (slen, bsz, in_dim)
    np.testing.assert_allclose(np.asarray(out), np.asarray(ref),
                               rtol=1e-4, atol=1e-4)

    # Case 2: two chunks (carried fast-weight state), exact f32 MXU path.
    slen2 = 16
    args2 = make_inputs(key1, slen2, bsz, in_dim)
    out2 = fast_ff_layer(*args2, num_head=num_head, dim_head=dim_head, chunk=8,
                         mxu_dtype=jnp.float32)
    out2 = jax.block_until_ready(out2)
    ref2 = reference_forward(*args2, num_head=num_head, dim_head=dim_head)
    np.testing.assert_allclose(np.asarray(out2), np.asarray(ref2),
                               rtol=1e-4, atol=1e-4)

    # Case 3: default bf16 MXU operands (f32 state / solve) -> relaxed tolerance.
    out3 = fast_ff_layer(*args2, num_head=num_head, dim_head=dim_head, chunk=8)
    out3 = jax.block_until_ready(out3)
    np.testing.assert_allclose(np.asarray(out3), np.asarray(ref2),
                               rtol=5e-2, atol=5e-2)

    print("KERNEL_OK")
</pallas_src>

<mosaic_0001>
module attributes {stable_mosaic.version = 11 : i64} {
  func.func @fast_ff_fused_kernel(%arg0: i32, %arg1: i32, %arg2: memref<1x8x32xf32, #tpu.memory_space<vmem>>, %arg3: memref<1x32xf32, #tpu.memory_space<vmem>>, %arg4: memref<1x32xf32, #tpu.memory_space<vmem>>, %arg5: memref<32x100xf32, #tpu.memory_space<vmem>>, %arg6: memref<32x32xf32, #tpu.memory_space<vmem>>, %arg7: memref<1x8x32xf32, #tpu.memory_space<vmem>>, %arg8: memref<4x8x8xf32, #tpu.memory_space<vmem>>) attributes {dimension_semantics = [#tpu.dimension_semantics<parallel>, #tpu.dimension_semantics<arbitrary>], iteration_bounds = array<i64: 2, 1>, scalar_prefetch = 0 : i64, scratch_operands = 1 : i64, tpu.core_type = #tpu.core_type<tc>, window_params = [{transform_indices = @transform_0, window_bounds = array<i64: 1, 8, 32>}, {pipeline_mode = #tpu.pipeline_mode<synchronous>, transform_indices = @transform_1, window_bounds = array<i64: 1, 32>}, {pipeline_mode = #tpu.pipeline_mode<synchronous>, transform_indices = @transform_2, window_bounds = array<i64: 1, 32>}, {pipeline_mode = #tpu.pipeline_mode<synchronous>, transform_indices = @transform_3, window_bounds = array<i64: 32, 100>}, {pipeline_mode = #tpu.pipeline_mode<synchronous>, transform_indices = @transform_4, window_bounds = array<i64: 32, 32>}, {transform_indices = @transform_5, window_bounds = array<i64: 1, 8, 32>}]} {
    %c0_i32 = arith.constant 0 : i32
    %0 = arith.cmpi eq, %arg1, %c0_i32 : i32
    %1 = arith.extui %0 : i1 to i32
    %c0_i32_0 = arith.constant 0 : i32
    %2 = arith.cmpi ne, %1, %c0_i32_0 : i32
    scf.if %2 {
      %cst_47 = arith.constant 0.000000e+00 : f32
      %144 = vector.broadcast %cst_47 : f32 to vector<4x8x8xf32>
      %c0_48 = arith.constant 0 : index
      %c0_49 = arith.constant 0 : index
      %c0_50 = arith.constant 0 : index
      %145 = vector.load %arg8[%c0_48, %c0_49, %c0_50] : memref<4x8x8xf32, #tpu.memory_space<vmem>>, vector<4x8x8xf32>
      tpu.vector_store %arg8[%c0_48, %c0_49, %c0_50], %144 {strides = array<i32>} : memref<4x8x8xf32, #tpu.memory_space<vmem>>, vector<4x8x8xf32>,
    } else {
    }
    %c0 = arith.constant 0 : index
    %c0_1 = arith.constant 0 : index
    %c0_2 = arith.constant 0 : index
    %3 = vector.load %arg2[%c0, %c0_1, %c0_2] : memref<1x8x32xf32, #tpu.memory_space<vmem>>, vector<1x8x32xf32>
    %4 = vector.shape_cast %3 : vector<1x8x32xf32> to vector<8x32xf32>
    %cst = arith.constant dense<0.000000e+00> : vector<8xf32>
    %5 = vector.multi_reduction <add>, %4, %cst [1] : vector<8x32xf32> to vector<8xf32>
    %6 = vector.shape_cast %5 : vector<8xf32> to vector<8x1xf32>
    %cst_3 = arith.constant 3.200000e+01 : f32
    %7 = vector.broadcast %cst_3 : f32 to vector<8x1xf32>
    %8 = arith.divf %6, %7 : vector<8x1xf32>
    %9 = vector.broadcast %8 : vector<8x1xf32> to vector<8x32xf32>
    %10 = arith.subf %4, %9 : vector<8x32xf32>
    %11 = arith.mulf %10, %10 : vector<8x32xf32>
    %cst_4 = arith.constant dense<0.000000e+00> : vector<8xf32>
    %12 = vector.multi_reduction <add>, %11, %cst_4 [1] : vector<8x32xf32> to vector<8xf32>
    %13 = vector.shape_cast %12 : vector<8xf32> to vector<8x1xf32>
    %cst_5 = arith.constant 3.200000e+01 : f32
    %14 = vector.broadcast %cst_5 : f32 to vector<8x1xf32>
    %15 = arith.divf %13, %14 : vector<8x1xf32>
    %cst_6 = arith.constant 9.99999974E-6 : f32
    %16 = vector.broadcast %cst_6 : f32 to vector<8x1xf32>
    %17 = arith.addf %15, %16 : vector<8x1xf32>
    %18 = math.rsqrt %17 : vector<8x1xf32>
    %19 = vector.broadcast %18 : vector<8x1xf32> to vector<8x32xf32>
    %20 = arith.mulf %10, %19 : vector<8x32xf32>
    %c0_7 = arith.constant 0 : index
    %c0_8 = arith.constant 0 : index
    %21 = vector.load %arg3[%c0_7, %c0_8] : memref<1x32xf32, #tpu.memory_space<vmem>>, vector<1x32xf32>
    %22 = vector.broadcast %21 : vector<1x32xf32> to vector<8x32xf32>
    %23 = arith.mulf %20, %22 : vector<8x32xf32>
    %c0_9 = arith.constant 0 : index
    %c0_10 = arith.constant 0 : index
    %24 = vector.load %arg4[%c0_9, %c0_10] : memref<1x32xf32, #tpu.memory_space<vmem>>, vector<1x32xf32>
    %25 = vector.broadcast %24 : vector<1x32xf32> to vector<8x32xf32>
    %26 = arith.addf %23, %25 : vector<8x32xf32>
    %c0_11 = arith.constant 0 : index
    %c0_12 = arith.constant 0 : index
    %27 = vector.load %arg5[%c0_11, %c0_12] : memref<32x100xf32, #tpu.memory_space<vmem>>, vector<32x100xf32>
    %cst_13 = arith.constant dense<0.000000e+00> : vector<8x100xf32>
    %28 = tpu.matmul %26, %27, %cst_13 {dimension_numbers = #tpu.dot_dimension_numbers<[1], [0], [0], [1], [0, 0, 1, 1], [], []>} : vector<8x32xf32>, vector<32x100xf32>, vector<8x100xf32> -> vector<8x100xf32>
    %29 = vector.extract_strided_slice %28 {offsets = [0, 0], sizes = [8, 8], strides = [1, 1]} : vector<8x100xf32> to vector<8x8xf32>
    %30 = vector.extract_strided_slice %28 {offsets = [0, 8], sizes = [8, 8], strides = [1, 1]} : vector<8x100xf32> to vector<8x8xf32>
    %31 = vector.extract_strided_slice %28 {offsets = [0, 16], sizes = [8, 8], strides = [1, 1]} : vector<8x100xf32> to vector<8x8xf32>
    %32 = vector.extract_strided_slice %28 {offsets = [0, 24], sizes = [8, 8], strides = [1, 1]} : vector<8x100xf32> to vector<8x8xf32>
    %33 = vector.shape_cast %29 : vector<8x8xf32> to vector<1x8x8xf32>
    %34 = vector.shape_cast %30 : vector<8x8xf32> to vector<1x8x8xf32>
    %35 = vector.shape_cast %31 : vector<8x8xf32> to vector<1x8x8xf32>
    %36 = vector.shape_cast %32 : vector<8x8xf32> to vector<1x8x8xf32>
    %37 = tpu.concatenate %33, %34, %35, %36 in 0 : vector<1x8x8xf32>, vector<1x8x8xf32>, vector<1x8x8xf32>, vector<1x8x8xf32> -> vector<4x8x8xf32>
    %38 = vector.extract_strided_slice %28 {offsets = [0, 32], sizes = [8, 8], strides = [1, 1]} : vector<8x100xf32> to vector<8x8xf32>
    %39 = vector.extract_strided_slice %28 {offsets = [0, 40], sizes = [8, 8], strides = [1, 1]} : vector<8x100xf32> to vector<8x8xf32>
    %40 = vector.extract_strided_slice %28 {offsets = [0, 48], sizes = [8, 8], strides = [1, 1]} : vector<8x100xf32> to vector<8x8xf32>
    %41 = vector.extract_strided_slice %28 {offsets = [0, 56], sizes = [8, 8], strides = [1, 1]} : vector<8x100xf32> to vector<8x8xf32>
    %42 = vector.shape_cast %38 : vector<8x8xf32> to vector<1x8x8xf32>
    %43 = vector.shape_cast %39 : vector<8x8xf32> to vector<1x8x8xf32>
    %44 = vector.shape_cast %40 : vector<8x8xf32> to vector<1x8x8xf32>
    %45 = vector.shape_cast %41 : vector<8x8xf32> to vector<1x8x8xf32>
    %46 = tpu.concatenate %42, %43, %44, %45 in 0 : vector<1x8x8xf32>, vector<1x8x8xf32>, vector<1x8x8xf32>, vector<1x8x8xf32> -> vector<4x8x8xf32>
    %47 = vector.extract_strided_slice %28 {offsets = [0, 64], sizes = [8, 8], strides = [1, 1]} : vector<8x100xf32> to vector<8x8xf32>
    %48 = vector.extract_strided_slice %28 {offsets = [0, 72], sizes = [8, 8], strides = [1, 1]} : vector<8x100xf32> to vector<8x8xf32>
    %49 = vector.extract_strided_slice %28 {offsets = [0, 80], sizes = [8, 8], strides = [1, 1]} : vector<8x100xf32> to vector<8x8xf32>
    %50 = vector.extract_strided_slice %28 {offsets = [0, 88], sizes = [8, 8], strides = [1, 1]} : vector<8x100xf32> to vector<8x8xf32>
    %51 = vector.shape_cast %47 : vector<8x8xf32> to vector<1x8x8xf32>
    %52 = vector.shape_cast %48 : vector<8x8xf32> to vector<1x8x8xf32>
    %53 = vector.shape_cast %49 : vector<8x8xf32> to vector<1x8x8xf32>
    %54 = vector.shape_cast %50 : vector<8x8xf32> to vector<1x8x8xf32>
    %55 = tpu.concatenate %51, %52, %53, %54 in 0 : vector<1x8x8xf32>, vector<1x8x8xf32>, vector<1x8x8xf32>, vector<1x8x8xf32> -> vector<4x8x8xf32>
    %56 = vector.extract_strided_slice %28 {offsets = [0, 96], sizes = [8, 1], strides = [1, 1]} : vector<8x100xf32> to vector<8x1xf32>
    %57 = vector.extract_strided_slice %28 {offsets = [0, 97], sizes = [8, 1], strides = [1, 1]} : vector<8x100xf32> to vector<8x1xf32>
    %58 = vector.extract_strided_slice %28 {offsets = [0, 98], sizes = [8, 1], strides = [1, 1]} : vector<8x100xf32> to vector<8x1xf32>
    %59 = vector.extract_strided_slice %28 {offsets = [0, 99], sizes = [8, 1], strides = [1, 1]} : vector<8x100xf32> to vector<8x1xf32>
    %60 = vector.shape_cast %56 : vector<8x1xf32> to vector<1x8x1xf32>
    %61 = vector.shape_cast %57 : vector<8x1xf32> to vector<1x8x1xf32>
    %62 = vector.shape_cast %58 : vector<8x1xf32> to vector<1x8x1xf32>
    %63 = vector.shape_cast %59 : vector<8x1xf32> to vector<1x8x1xf32>
    %64 = tpu.concatenate %60, %61, %62, %63 in 0 : vector<1x8x1xf32>, vector<1x8x1xf32>, vector<1x8x1xf32>, vector<1x8x1xf32> -> vector<4x8x1xf32>
    %65 = arith.negf %64 : vector<4x8x1xf32>
    %66 = math.exp %65 : vector<4x8x1xf32>
    %cst_14 = arith.constant 1.000000e+00 : f32
    %67 = vector.broadcast %cst_14 : f32 to vector<4x8x1xf32>
    %68 = arith.addf %67, %66 : vector<4x8x1xf32>
    %69 = arith.divf %67, %68 : vector<4x8x1xf32>
    %cst_15 = arith.constant 0.000000e+00 : f32
    %70 = vector.broadcast %cst_15 : f32 to vector<4x8x8xf32>
    %71 = arith.cmpf ogt, %37, %70 : vector<4x8x8xf32>
    %cst_16 = arith.constant 1.000000e+00 : f32
    %72 = vector.broadcast %cst_16 : f32 to vector<4x8x8xf32>
    %73 = arith.addf %37, %72 : vector<4x8x8xf32>
    %74 = math.exp %37 : vector<4x8x8xf32>
    %75 = arith.select %71, %73, %74 : vector<4x8x8xi1>, vector<4x8x8xf32>
    %cst_17 = arith.constant dense<0.000000e+00> : vector<4x8xf32>
    %76 = vector.multi_reduction <add>, %75, %cst_17 [2] : vector<4x8x8xf32> to vector<4x8xf32>
    %77 = vector.shape_cast %76 : vector<4x8xf32> to vector<4x8x1xf32>
    %78 = vector.broadcast %77 : vector<4x8x1xf32> to vector<4x8x8xf32>
    %79 = arith.divf %75, %78 : vector<4x8x8xf32>
    %cst_18 = arith.constant 0.000000e+00 : f32
    %80 = vector.broadcast %cst_18 : f32 to vector<4x8x8xf32>
    %81 = arith.cmpf ogt, %46, %80 : vector<4x8x8xf32>
    %cst_19 = arith.constant 1.000000e+00 : f32
    %82 = vector.broadcast %cst_19 : f32 to vector<4x8x8xf32>
    %83 = arith.addf %46, %82 : vector<4x8x8xf32>
    %84 = math.exp %46 : vector<4x8x8xf32>
    %85 = arith.select %81, %83, %84 : vector<4x8x8xi1>, vector<4x8x8xf32>
    %cst_20 = arith.constant dense<0.000000e+00> : vector<4x8xf32>
    %86 = vector.multi_reduction <add>, %85, %cst_20 [2] : vector<4x8x8xf32> to vector<4x8xf32>
    %87 = vector.shape_cast %86 : vector<4x8xf32> to vector<4x8x1xf32>
    %88 = vector.broadcast %87 : vector<4x8x1xf32> to vector<4x8x8xf32>
    %89 = arith.divf %85, %88 : vector<4x8x8xf32>
    %c0_21 = arith.constant 0 : index
    %c0_22 = arith.constant 0 : index
    %c0_23 = arith.constant 0 : index
    %90 = vector.load %arg8[%c0_21, %c0_22, %c0_23] : memref<4x8x8xf32, #tpu.memory_space<vmem>>, vector<4x8x8xf32>
    %cst_24 = arith.constant dense<0.000000e+00> : vector<4x8x8xf32>
    %91 = tpu.matmul %89, %90, %cst_24 {dimension_numbers = #tpu.dot_dimension_numbers<[2], [1], [1], [2], [0, 0, 0, 1, 1, 2], [0], [0]>} : vector<4x8x8xf32>, vector<4x8x8xf32>, vector<4x8x8xf32> -> vector<4x8x8xf32>
    %92 = arith.subf %55, %91 : vector<4x8x8xf32>
    %93 = vector.broadcast %69 : vector<4x8x1xf32> to vector<4x8x8xf32>
    %94 = arith.mulf %93, %92 : vector<4x8x8xf32>
    %95 = tpu.iota {dimensions = array<i32: 0>} : vector<8x8xi32>
    %96 = tpu.iota {dimensions = array<i32: 1>} : vector<8x8xi32>
    %97 = arith.cmpi sgt, %95, %96 : vector<8x8xi32>
    %98 = vector.shape_cast %97 : vector<8x8xi1> to vector<1x8x8xi1>
    %99 = arith.cmpi sge, %95, %96 : vector<8x8xi32>
    %100 = vector.shape_cast %99 : vector<8x8xi1> to vector<1x8x8xi1>
    %cst_25 = arith.constant dense<0.000000e+00> : vector<4x8x8xf32>
    %101 = tpu.matmul %89, %89, %cst_25 {dimension_numbers = #tpu.dot_dimension_numbers<[2], [2], [1], [1], [0, 0, 0, 1, 1, 1], [0], [0]>} : vector<4x8x8xf32>, vector<4x8x8xf32>, vector<4x8x8xf32> -> vector<4x8x8xf32>
    %cst_26 = arith.constant 0.000000e+00 : f32
    %102 = vector.shape_cast %98 : vector<1x8x8xi1> to vector<1x8x8xi1>
    %103 = vector.broadcast %102 : vector<1x8x8xi1> to vector<4x8x8xi1>
    %104 = vector.broadcast %cst_26 : f32 to vector<4x8x8xf32>
    %105 = arith.select %103, %101, %104 : vector<4x8x8xi1>, vector<4x8x8xf32>
    %cst_27 = arith.constant 0.000000e+00 : f32
    %106 = vector.broadcast %cst_27 : f32 to vector<4x8x1xf32>
    %107 = arith.subf %106, %69 : vector<4x8x1xf32>
    %108 = vector.broadcast %107 : vector<4x8x1xf32> to vector<4x8x8xf32>
    %109 = arith.mulf %105, %108 : vector<4x8x8xf32>
    %cst_28 = arith.constant dense<0.000000e+00> : vector<4x8x8xf32>
    %110 = tpu.matmul %109, %94, %cst_28 {dimension_numbers = #tpu.dot_dimension_numbers<[2], [1], [1], [2], [0, 0, 0, 1, 1, 2], [0], [0]>} : vector<4x8x8xf32>, vector<4x8x8xf32>, vector<4x8x8xf32> -> vector<4x8x8xf32>
    %111 = arith.addf %94, %110 : vector<4x8x8xf32>
    %cst_29 = arith.constant dense<0.000000e+00> : vector<4x8x8xf32>
    %112 = tpu.matmul %109, %109, %cst_29 {dimension_numbers = #tpu.dot_dimension_numbers<[2], [1], [1], [2], [0, 0, 0, 1, 1, 2], [0], [0]>} : vector<4x8x8xf32>, vector<4x8x8xf32>, vector<4x8x8xf32> -> vector<4x8x8xf32>
    %cst_30 = arith.constant dense<0.000000e+00> : vector<4x8x8xf32>
    %113 = tpu.matmul %112, %111, %cst_30 {dimension_numbers = #tpu.dot_dimension_numbers<[2], [1], [1], [2], [0, 0, 0, 1, 1, 2], [0], [0]>} : vector<4x8x8xf32>, vector<4x8x8xf32>, vector<4x8x8xf32> -> vector<4x8x8xf32>
    %114 = arith.addf %111, %113 : vector<4x8x8xf32>
    %cst_31 = arith.constant dense<0.000000e+00> : vector<4x8x8xf32>
    %115 = tpu.matmul %112, %112, %cst_31 {dimension_numbers = #tpu.dot_dimension_numbers<[2], [1], [1], [2], [0, 0, 0, 1, 1, 2], [0], [0]>} : vector<4x8x8xf32>, vector<4x8x8xf32>, vector<4x8x8xf32> -> vector<4x8x8xf32>
    %cst_32 = arith.constant dense<0.000000e+00> : vector<4x8x8xf32>
    %116 = tpu.matmul %115, %114, %cst_32 {dimension_numbers = #tpu.dot_dimension_numbers<[2], [1], [1], [2], [0, 0, 0, 1, 1, 2], [0], [0]>} : vector<4x8x8xf32>, vector<4x8x8xf32>, vector<4x8x8xf32> -> vector<4x8x8xf32>
    %117 = arith.addf %114, %116 : vector<4x8x8xf32>
    %cst_33 = arith.constant dense<0.000000e+00> : vector<4x8x8xf32>
    %118 = tpu.matmul %79, %89, %cst_33 {dimension_numbers = #tpu.dot_dimension_numbers<[2], [2], [1], [1], [0, 0, 0, 1, 1, 1], [0], [0]>} : vector<4x8x8xf32>, vector<4x8x8xf32>, vector<4x8x8xf32> -> vector<4x8x8xf32>
    %cst_34 = arith.constant 0.000000e+00 : f32
    %119 = vector.shape_cast %100 : vector<1x8x8xi1> to vector<1x8x8xi1>
    %120 = vector.broadcast %119 : vector<1x8x8xi1> to vector<4x8x8xi1>
    %121 = vector.broadcast %cst_34 : f32 to vector<4x8x8xf32>
    %122 = arith.select %120, %118, %121 : vector<4x8x8xi1>, vector<4x8x8xf32>
    %cst_35 = arith.constant dense<0.000000e+00> : vector<4x8x8xf32>
    %123 = tpu.matmul %79, %90, %cst_35 {dimension_numbers = #tpu.dot_dimension_numbers<[2], [1], [1], [2], [0, 0, 0, 1, 1, 2], [0], [0]>} : vector<4x8x8xf32>, vector<4x8x8xf32>, vector<4x8x8xf32> -> vector<4x8x8xf32>
    %cst_36 = arith.constant dense<0.000000e+00> : vector<4x8x8xf32>
    %124 = tpu.matmul %122, %117, %cst_36 {dimension_numbers = #tpu.dot_dimension_numbers<[2], [1], [1], [2], [0, 0, 0, 1, 1, 2], [0], [0]>} : vector<4x8x8xf32>, vector<4x8x8xf32>, vector<4x8x8xf32> -> vector<4x8x8xf32>
    %125 = arith.addf %123, %124 : vector<4x8x8xf32>
    %cst_37 = arith.constant dense<0.000000e+00> : vector<4x8x8xf32>
    %126 = tpu.matmul %89, %117, %cst_37 {dimension_numbers = #tpu.dot_dimension_numbers<[1], [1], [2], [2], [0, 0, 0, 2, 1, 2], [0], [0]>} : vector<4x8x8xf32>, vector<4x8x8xf32>, vector<4x8x8xf32> -> vector<4x8x8xf32>
    %127 = arith.addf %90, %126 : vector<4x8x8xf32>
    %c0_38 = arith.constant 0 : index
    %c0_39 = arith.constant 0 : index
    %c0_40 = arith.constant 0 : index
    %128 = vector.load %arg8[%c0_38, %c0_39, %c0_40] : memref<4x8x8xf32, #tpu.memory_space<vmem>>, vector<4x8x8xf32>
    tpu.vector_store %arg8[%c0_38, %c0_39, %c0_40], %127 {strides = array<i32>} : memref<4x8x8xf32, #tpu.memory_space<vmem>>, vector<4x8x8xf32>,
    %129 = vector.extract_strided_slice %125 {offsets = [0, 0, 0], sizes = [1, 8, 8], strides = [1, 1, 1]} : vector<4x8x8xf32> to vector<1x8x8xf32>
    %130 = vector.shape_cast %129 : vector<1x8x8xf32> to vector<8x8xf32>
    %131 = vector.extract_strided_slice %125 {offsets = [1, 0, 0], sizes = [1, 8, 8], strides = [1, 1, 1]} : vector<4x8x8xf32> to vector<1x8x8xf32>
    %132 = vector.shape_cast %131 : vector<1x8x8xf32> to vector<8x8xf32>
    %133 = vector.extract_strided_slice %125 {offsets = [2, 0, 0], sizes = [1, 8, 8], strides = [1, 1, 1]} : vector<4x8x8xf32> to vector<1x8x8xf32>
    %134 = vector.shape_cast %133 : vector<1x8x8xf32> to vector<8x8xf32>
    %135 = vector.extract_strided_slice %125 {offsets = [3, 0, 0], sizes = [1, 8, 8], strides = [1, 1, 1]} : vector<4x8x8xf32> to vector<1x8x8xf32>
    %136 = vector.shape_cast %135 : vector<1x8x8xf32> to vector<8x8xf32>
    %137 = tpu.concatenate %130, %132, %134, %136 in 1 : vector<8x8xf32>, vector<8x8xf32>, vector<8x8xf32>, vector<8x8xf32> -> vector<8x32xf32>
    %c0_41 = arith.constant 0 : index
    %c0_42 = arith.constant 0 : index
    %138 = vector.load %arg6[%c0_41, %c0_42] : memref<32x32xf32, #tpu.memory_space<vmem>>, vector<32x32xf32>
    %cst_43 = arith.constant dense<0.000000e+00> : vector<8x32xf32>
    %139 = tpu.matmul %137, %138, %cst_43 {dimension_numbers = #tpu.dot_dimension_numbers<[1], [0], [0], [1], [0, 0, 1, 1], [], []>} : vector<8x32xf32>, vector<32x32xf32>, vector<8x32xf32> -> vector<8x32xf32>
    %140 = arith.addf %4, %139 : vector<8x32xf32>
    %c0_44 = arith.constant 0 : index
    %c0_45 = arith.constant 0 : index
    %c0_46 = arith.constant 0 : index
    %141 = vector.load %arg7[%c0_44, %c0_45, %c0_46] : memref<1x8x32xf32, #tpu.memory_space<vmem>>, vector<1x8x32xf32>
    %142 = vector.shape_cast %141 : vector<1x8x32xf32> to vector<8x32xf32>
    %143 = vector.shape_cast %140 : vector<8x32xf32> to vector<1x8x32xf32>
    tpu.vector_store %arg7[%c0_44, %c0_45, %c0_46], %143 {strides = array<i32>} : memref<1x8x32xf32, #tpu.memory_space<vmem>>, vector<1x8x32xf32>,
    return
  }
  func.func @transform_0(%arg0: i32, %arg1: i32) -> (i32, i32, i32) {
    %c0_i32 = arith.constant 0 : i32
    %c0_i32_0 = arith.constant 0 : i32
    return %arg0, %arg1, %c0_i32 : i32, i32, i32
  }
  func.func @transform_1(%arg0: i32, %arg1: i32) -> (i32, i32) {
    %c0_i32 = arith.constant 0 : i32
    %c0_i32_0 = arith.constant 0 : i32
    %c0_i32_1 = arith.constant 0 : i32
    return %c0_i32, %c0_i32_0 : i32, i32
  }
  func.func @transform_2(%arg0: i32, %arg1: i32) -> (i32, i32) {
    %c0_i32 = arith.constant 0 : i32
    %c0_i32_0 = arith.constant 0 : i32
    %c0_i32_1 = arith.constant 0 : i32
    return %c0_i32, %c0_i32_0 : i32, i32
  }
  func.func @transform_3(%arg0: i32, %arg1: i32) -> (i32, i32) {
    %c0_i32 = arith.constant 0 : i32
    %c0_i32_0 = arith.constant 0 : i32
    %c0_i32_1 = arith.constant 0 : i32
    return %c0_i32, %c0_i32_0 : i32, i32
  }
  func.func @transform_4(%arg0: i32, %arg1: i32) -> (i32, i32) {
    %c0_i32 = arith.constant 0 : i32
    %c0_i32_0 = arith.constant 0 : i32
    %c0_i32_1 = arith.constant 0 : i32
    return %c0_i32, %c0_i32_0 : i32, i32
  }
  func.func @transform_5(%arg0: i32, %arg1: i32) -> (i32, i32, i32) {
    %c0_i32 = arith.constant 0 : i32
    %c0_i32_0 = arith.constant 0 : i32
    return %arg0, %arg1, %c0_i32 : i32, i32, i32
  }
}

</mosaic_0001>

<bundles_post_ra>
// kernel: tpu_custom_call.1
= control target key start
LH: loop header
LB: loop body
LE: loop exit
PB: predicated region body
PF: predicated region fallthrough
CT: control target
= control target key end

     0   :  { %10 = vsyncpa [#allocation4], 0  ;;  %s5708_s0 = inlined_call_operand.hbm [shape: f32[2,8,32], index: 0, kind: input, shape index: {}, may-alias: {0,5}]   ;;  %s5709_s1 = inlined_call_operand.vmem [shape: f32[1,32], index: 1, kind: input, shape index: {}]   ;;  %s5710_s2 = inlined_call_operand.vmem [shape: f32[1,32], index: 2, kind: input, shape index: {}]   ;;  %s5711_s3 = inlined_call_operand.vmem [shape: f32[32,100], index: 3, kind: input, shape index: {}]   ;;  %s5712_s4 = inlined_call_operand.hbm [shape: f32[32,32], index: 4, kind: input, shape index: {}]   ;;  %s5713_s5 = inlined_call_operand.hbm [shape: f32[2,8,32], index: 5, kind: output, shape index: {}, may-alias: {0,5}]  }
   0x1   :  { %12 = vsyncpa [#allocation4 + $0x1], 0 }
   0x2   :  { %13 = vsyncpa [#allocation7], 0 }
   0x3   :  { %14 = vsyncpa [#allocation5], 0 }
   0x4   :  { %16 = vsyncpa [#allocation5 + $0x1], 0  ;;  %s5007_s18 = smov 0   ;;  %s5009_s19 = smov 0  }
   0x5   :  { %s5011_s20 = smov 0   ;;  %s5013_s21 = smov 0  }
   0x6   :  { %s5015_s22 = smov 0   ;;  %s5017_s23 = smov 0  }
   0x7 LB: > { %s4241_s24 = sadd.s32 4294967295, %s4955_s23   ;;  %s4242_s25 = sadd.s32 4294967294, %s4955_s23   ;;  %s4955_s23 = sphi %s5017_s23, %s22_s23   ;;  %s4951_s22 = sphi %s5015_s22, %s5737_s22   ;;  %s4947_s21 = sphi %s5013_s21, %s5736_s21   ;;  %s4943_s20 = sphi %s5011_s20, %s5735_s20   ;;  %s4939_s19 = sphi %s5009_s19, %s5734_s19   ;;  %s4935_s18 = sphi %s5007_s18, %s5733_s18  }
   0x8   : > { %p56_p0 = scmp.ne.s32.totalorder %s4939_s19, %s4935_s18  ;;  %p5041_p1 = scmp.eq.s32.totalorder %s4241_s24, 0 }
   0x9   : > { %p5045_p2 = scmp.eq.s32.totalorder %s4241_s24, 1  ;;  %p172_p3 = scmp.eq.s32.totalorder %s4242_s25, 1 }
   0xa   : > { %s5718_s26 = scalar_select %p5041_p1, 1, 0 }
   0xb   : > { %s5719_s27 = scalar_select %p5045_p2, 1, 0 }
   0xc   : > { %p5051_p4 = por %p5041_p1, %p56_p0  ;;  %p4243_p5 = scmp.ge.s32.totalorder %s4955_s23, 1 }
   0xd   : > { %p5056_p6 = por %p172_p3, %p56_p0  ;;  %p179_p7 = scmp.lt.s32.totalorder %s4955_s23, 3 }
   0xe   : > { %s5720_s28 = scalar_select %p5051_p4, 1, 0 }
   0xf   : > { %s5721_s29 = scalar_select %p5056_p6, 1, 0 }
  0x10   : > { %p5061_p8 = pnand %p4243_p5, %p179_p7  ;;  %s4957_s6 = smov [#allocation6]  }
  0x11   : > { %s200_s7 = sshll.u32 %s4957_s6, 4  ;;  %s34_s9 = sadd.s32 1, %s4951_s22  ;;  %s201_s7 = int_to_ptr.vmem [resolvable:$true] %s200_s7 }
  0x12   : > { %s5722_s30 = scalar_select %p5061_p8, 1, 0 }
  0x13   : > { %p4684_p9 = pneg %p5061_p8  ;;  %s4811_s12 = scalar_lea.hbm %s5712_s4, 512 }
  0x14   : > { %p4812_p12 = scmp.ne.s32.totalorder %s5712_s4, %s4811_s12  ;;  %p4818_p5 = scmp.lt.u32.totalorder %s4811_s12, %s5712_s4 }
  0x15   : > { %p5070_p11 = pnand %p4684_p9, %p5041_p1 }
  0x17   : > { %p4813_p13 = pneg %p5070_p11 }
  0x19   : > { %p4814_p0 = pnand %p4813_p13, %p4812_p12 }
  0x1b   : > { %p4815_p3 = pneg %p4814_p0 }
  0x1d   : > { %p4820_p7 = pnand %p4818_p5, %p4815_p3 }
  0x1f   : > { %4823 = shalt.err (!%p4820_p7)
}
  0x20   : > { %s4824_s17 = scalar_lea.vmem %s201_s7, 512  ;;  %p4832_p1 = scmp.lt.s32.totalorder %s201_s7, %s201_s7 }
  0x21   : > { %p4825_p9 = scmp.ne.s32.totalorder %s201_s7, %s4824_s17  ;;  %p4833_p4 = scmp.lt.s32.totalorder %s4824_s17, %s4824_s17 }
  0x23   : > { %p4827_p10 = pnand %p4825_p9, %p4813_p13  ;;  %p4834_p8 = por %p4833_p4, %p4832_p1 }
  0x25   : > { %p4828_p6 = pneg %p4827_p10 }
  0x27   : > { %p4835_p2 = pnand %p4834_p8, %p4828_p6 }
  0x29   : > { %4838 = shalt.err (!%p4835_p2)
}
  0x2a   : > { %s4958_s24 = smov 128   ;;  %s4959_s25 = smov 8  }
  0x2b   : > { %4687 = dma.hbm_to_vmem [thread:$0]  (!%p5070_p11), %s5712_s4, 512, %s201_s7, [#allocation7], %s4958_s24, %s4958_s24, %s4959_s25  }
  0x2c   : > { %p36_p1 = scmp.ge.s32.totalorder %s34_s9, 2  ;;  %s43_s11 = sadd.s32 1, %s4943_s20 }
  0x2d   : > { %p50_p2 = scmp.ne.s32.totalorder %s4943_s20, %s4939_s19  ;;  %p51_p4 = scmp.eq.s32.totalorder %s4955_s23, 0 }
  0x2e   : > { %s5739_s9 = smov (%p36_p1, %s34_s9), 0  ;;  %p5725_p8 = scmp.ne.s32.totalorder %s5719_s27, 0 }
  0x2f   : > { %p5097_p6 = por %p51_p4, %p50_p2  ;;  %s38_s8 = ssub.s32 %s4951_s22, %s5739_s9 }
  0x30   : > { %p5103_p10 = por %p5725_p8, %p50_p2  ;;  %p4697_p12 = scmp.lt.s32.totalorder %s4955_s23, 2 }
  0x31   : > { %p41_p11 = scmp.eq.s32.totalorder %s38_s8, 0  ;;  %s214_s7 = sand.u32 1, %s4943_s20  }
  0x32   : > { %s4246_s14 = sshll.u32 %s214_s7, 3  ;;  %s4247_s16 = sshll.u32 %s4951_s22, 7 }
  0x33   : > { %s5112_s15 = scalar_select %p41_p11, %s4943_s20, %s43_s11  }
  0x34   : > { %s5118_s25 = scalar_lea.hbm %s5708_s0, %s4247_s16  ;;  %s218_s27 = scalar_lea.vmem [#allocation3], %s4246_s14 }
  0x35   : > { %s226_s6 = sshll.u32 %s218_s27, 4  ;;  %p5124_p13 = pnand %p4697_p12, %p5097_p6  ;;  %s5120_s6 = int_to_ptr.vmem [resolvable:$true] %s226_s6 }
  0x36   : > { %s215_s11 = scalar_lea.sflag [#allocation4], %s214_s7  ;;  %s4839_s8 = scalar_lea.hbm %s5118_s25, 128 }
  0x37   : > { %p4840_p0 = scmp.ne.s32.totalorder %s5118_s25, %s4839_s8  ;;  %p4841_p3 = pneg %p5124_p13 }
  0x38   : > { %s4844_s17 = scalar_lea.hbm %s5708_s0, 256  ;;  %p4845_p9 = scmp.lt.u32.totalorder %s5118_s25, %s5708_s0 }
  0x39   : > { %p4842_p5 = pnand %p4841_p3, %p4840_p0  ;;  %p4846_p1 = scmp.lt.u32.totalorder %s4844_s17, %s4839_s8 }
  0x3a   : > { %p4848_p4 = scmp.lt.u32.totalorder %s4839_s8, %s5118_s25 }
  0x3b   : > { %p4843_p7 = pneg %p4842_p5  ;;  %p4847_p2 = por %p4846_p1, %p4845_p9 }
  0x3d   : > { %p4849_p6 = por %p4848_p4, %p4847_p2 }
  0x3f   : > { %p4850_p8 = pnand %p4849_p6, %p4843_p7 }
  0x41   : > { %4853 = shalt.err (!%p4850_p8)
}
  0x42   : > { %s4854_s7 = scalar_lea.vmem %s5120_s6, 128  ;;  %s4960_s27 = smov [#allocation3]  }
  0x43   : > { %p4855_p12 = scmp.ne.s32.totalorder %s5120_s6, %s4854_s7  ;;  %s4859_s14 = sshll.u32 %s4960_s27, 4  ;;  %s4860_s14 = int_to_ptr.vmem [resolvable:$false] %s4859_s14 }
  0x44   : > { %s4861_s16 = scalar_lea.vmem %s4860_s14, 256  ;;  %p4862_p5 = scmp.lt.s32.totalorder %s5120_s6, %s4860_s14 }
  0x45   : > { %p4857_p11 = pnand %p4855_p12, %p4841_p3  ;;  %p4863_p9 = scmp.lt.s32.totalorder %s4861_s16, %s4854_s7 }
  0x47   : > { %p4858_p0 = pneg %p4857_p11  ;;  %p4864_p1 = por %p4863_p9, %p4862_p5 }
  0x49   : > { %p4865_p2 = pnand %p4864_p1, %p4858_p0 }
  0x4b   : > { %4868 = shalt.err (!%p4865_p2)
}
  0x4c   : > { %4691 = dma.hbm_to_vmem [thread:$0]  (!%p5124_p13), %s5118_s25, 128, %s5120_s6, %s215_s11  }
  0x4d   : > { %p5728_p7 = scmp.ne.s32.totalorder %s5722_s30, 0 }
  0x4e   : > { %s5156_s8 = sand.u32 (!%p5728_p7), 1, %s4939_s19   ;;  %p5729_p3 = scmp.ne.s32.totalorder (!%p5728_p7), %s5720_s28, 0 }
  0x4f   : > { %235 = sbr.rel (%p5728_p7) target bundleno = 3547 (0xddb), region = 40  ;;  %s4249_s17 = sshll.u32 (!%p5728_p7), %s5156_s8, 3 }
  0x50   : > { %s238_s12 = scalar_lea.sflag (!%p5728_p7), [#allocation4], %s5156_s8  ;;  %s5162_s24 = scalar_lea.vmem (!%p5728_p7), [#allocation3], %s4249_s17 }
  0x56   : > { %4922 = dma.done.wait (%p5729_p3), %s238_s12, 128  }
  0x57   : > { %4924 = vsyncadd (%p5729_p3), %s238_s12, 4294967168  ;;  %p5730_p13 = scmp.ne.s32.totalorder %s5718_s26, 0 }
  0x59   : > { %4926 = dma.done.wait (%p5730_p13), [#allocation7], 512  }
  0x5a   : > { %4928 = vsyncadd (%p5730_p13), [#allocation7], 4294966784  ;;  %vm282_vm0 = vcmask 261120   ;;  %v281_v0 = vld [vmem:[%s5162_s24] sm:$0xff]  ;;  %v315_v9 = vld [vmem:[%s5711_s3 + $0x10] sm:$0xff]  ;;  %v4961_v10 = vmov 0.0|0.0  }
  0x5b   : > { %v283_v1 = vsel %vm282_vm0, %v281_v0, 0.0  ;;  %v313_v7 = vld [vmem:[%s5711_s3] sm:$0xff]  ;;  %v314_v8 = vld [vmem:[%s5711_s3 + $0x8] sm:$0xff]  ;;  %4656 = vmatprep.subr.bf16.mxu0 %v4961_v10  ;;  %v316_v12 = vld [vmem:[%s5711_s3 + $0x18] sm:$0xff]  ;;  %vm4962_vm1 = vmmov 0   ;;  %v4963_v13 = vmov 0.0  }
  0x5c   : > { %284 = vadd.xlane.f32.xlu0 %v283_v1  ;;  %v4657_v11 = vpack.c.bf16 %v314_v8, %v313_v7  ;;  %4422 = vmatprep.mubr.msk.f32.mxu0 %vm4962_vm1, %v4963_v13  ;;  %v4660_v14 = vpack.c.bf16 %v316_v12, %v315_v9  ;;  %v4252_v19 = vld [vmem:[%s5709_s1] ss:$0 sm:$0xff]  ;;  %vm276_vm2 = vcmask 64512   ;;  %s4964_s28 = smov 104   ;;  %s4965_s30 = smov 120   ;;  %v4968_v53 = vmov 96  }
  0x5d   : > { %4430 = vmatprep.subr.mxu1 %v4963_v13  ;;  %4432 = vmatprep.mubr.msk.f32.mxu1 %vm4962_vm1, %v4963_v13  ;;  %v4253_v21 = vld [vmem:[%s5710_s2] ss:$0 sm:$0xff]  ;;  %277 = vst.msk [vmem:[#allocation2] sm:$0xff] %vm276_vm2, %v4963_v13  ;;  %278 = vst.msk [vmem:[#allocation2 + $0x8] sm:$0xff] %vm276_vm2, %v4963_v13  ;;  %s4966_s25 = smov 112   ;;  %s4967_s26 = smov 96  }
  0x5e   : > { %4658 = vmatpush3.bf16.msra.mxu0 %v4657_v11  ;;  %279 = vst.msk [vmem:[#allocation2 + $0x10] sm:$0xff] %vm276_vm2, %v4963_v13  ;;  %280 = vst.msk [vmem:[#allocation2 + $0x18] sm:$0xff] %vm276_vm2, %v4963_v13  ;;  %4766 = vset.pattern.permute.xlu1 %v4968_v53  ;;  %s4969_s6 = smov 127   ;;  %s4970_s10 = smov 125   ;;  %vm4053_vm9 = vcmask 130048   ;;  %vm4055_vm10 = vcmask 195584  }
  0x5f   : > { %4659 = vmatprep.subr.bf16.mxu0 %v4961_v10  ;;  %4767 = vset.pattern.permute.xlu0 %v4968_v53  ;;  %s4971_s11 = smov 126   ;;  %s4972_s7 = smov 64  }
  0x60   : > { %s4973_s27 = smov 16   ;;  %s4974_s14 = smov 8  }
  0x61   : > { %s4975_s16 = smov 24   ;;  %s4313_s12 = sshll.u32 %s4947_s21, 7 }
  0x62   : > { %4661 = vmatpush3.bf16.msra.mxu0 %v4660_v14  ;;  %s4137_s21 = scalar_lea.sflag [#allocation5], %s5156_s8 }
  0x63   : > { %4425 = vmatprep.subr.mxu0 %v4963_v13 }
  0x64   : > { %v5255_v54 = vld [vmem:[#allocation2] sm:$0xff]  ;;  %v5258_v56 = vld [vmem:[#allocation2 + $0x8] sm:$0xff] }
  0x65   : > { %4431 = vmatpush3.msra.mxu1 %v5258_v56  ;;  %v5278_v8 = vld [vmem:[#allocation2 + $0x18] sm:$0xff]  ;;  %v5288_v11 = vld [vmem:[#allocation2 + $0x10] sm:$0xff] }
  0x66   : > { %4435 = vmatprep.subr.mxu1 %v4963_v13 }
  0xe9   : > { %v285_v2 = vpop.xlane.xlu0 %284 }
  0xea   : > { %v287_v3 = vmul.f32 0.03125, %v285_v2 }
  0xec   : > { %v288_v4 = vsub.f32 %v281_v0, %v287_v3 }
  0xee   : > { %v289_v5 = vmul.f32 %v288_v4, %v288_v4 }
  0xf0   : > { %v290_v6 = vsel %vm282_vm0, %v289_v5, 0.0 }
  0xf1   : > { %291 = vadd.xlane.f32.xlu0 %v290_v6 }
 0x17e   : > { %v292_v15 = vpop.xlane.xlu0 %291 }
 0x17f   : > { %v293_v16 = vmul.f32 0.03125, %v292_v15 }
 0x181   : > { %v294_v17 = vadd.f32 1e-05, %v293_v16 }
 0x183   : > { %4768 = vrsqrt.f32 %v294_v17 }
 0x18d   : > { %v4769_v18 = vpop.eup %4768 }
 0x18e   : > { %v296_v20 = vmul.f32 %v4769_v18, %v288_v4 }
 0x190   : > { %v304_v22 = vmul.f32 %v4252_v19, %v296_v20 }
 0x192   : > { %v312_v23 = vadd.f32 %v4253_v21, %v304_v22 }
 0x194   : > { %4423 = vmatmul.mubr.msk.f32.vlgmr.msra.gmra.mrb[0].mxu0 %vm282_vm0, %v312_v23 }
 0x195   : > { %4427 = vmatprep.mubr.msk.f32.mxu0 %vm4962_vm1, %v4963_v13  ;;  %4426 = vmatpush3.msra.mxu0 %v5255_v54 }
 0x196   : > { %4440 = vmatprep.subr.mxu0 %v4963_v13 }
 0x267   : > { %v5212_v24 = vpop.f32.mrb[0].mxu0 }
 0x268   : > { %397 = vrot.lane.b32.xlu0 %v5212_v24, %s4964_s28  ;;  %391 = vrot.lane.b32.xlu1 %v5212_v24, %s4965_s30  ;;  %v4424_v25 = vpop.f32.mrb[1].mxu0  ;;  %v441_v26 = vmul.f32 1.442695, %v5212_v24  ;;  %v437_v27 = vadd.f32 1.0, %v5212_v24  ;;  %vm433_vm3 = vcmp.gt.f32.partialorder %v5212_v24, 0.0  ;;  %s271_s28 = scalar_lea.vmem [#allocation8], %s4249_s17 }
 0x269   : > { %v4255_v59 = vmul.f32 -1.442695, %v5212_v24  ;;  %s4151_s30 = sshll.u32 %s271_s28, 4  ;;  %s4976_s17 = smov [#allocation8]   ;;  %s5660_s30 = int_to_ptr.vmem [resolvable:$true] %s4151_s30 }
 0x26a   : > { %4770 = vpow2.f32 %v441_v26 }
 0x26c   : > { %394 = vrot.lane.b32.xlu1 %v5212_v24, %s4966_s25 }
 0x274   : > { %v4771_v28 = vpop.eup %4770 }
 0x275   : > { %v5220_v29 = vsel %vm433_vm3, %v437_v27, %v4771_v28 }
 0x276   : > { %478 = vrot.lane.b32.xlu1 %v5220_v29, %s4967_s26 }
 0x2da   : > { %v5224_v30 = vpop.permute.xlu1 %391  ;;  %v5227_v32 = vpop.permute.xlu0 %397 }
 0x2db   : > { %v443_v31 = vmul.f32 1.442695, %v5224_v30  ;;  %v447_v35 = vmul.f32 1.442695, %v5227_v32  ;;  %v438_v36 = vadd.f32 1.0, %v5224_v30  ;;  %vm434_vm4 = vcmp.gt.f32.partialorder %v5224_v30, 0.0 }
 0x2dc   : > { %v440_v43 = vadd.f32 1.0, %v5227_v32  ;;  %vm436_vm6 = vcmp.gt.f32.partialorder %v5227_v32, 0.0 }
 0x2dd   : > { %4772 = vpow2.f32 %v443_v31 }
 0x2de   : > { %v5229_v33 = vpop.permute.xlu1 %394 }
 0x2df   : > { %v445_v34 = vmul.f32 1.442695, %v5229_v33  ;;  %v439_v39 = vadd.f32 1.0, %v5229_v33  ;;  %vm435_vm5 = vcmp.gt.f32.partialorder %v5229_v33, 0.0 }
 0x2e1   : > { %4774 = vpow2.f32 %v445_v34 }
 0x2e2   : > { %4776 = vpow2.f32 %v447_v35 }
 0x2e7   : > { %v4773_v37 = vpop.eup %4772 }
 0x2e8   : > { %v5235_v38 = vsel %vm434_vm4, %v438_v36, %v4773_v37  ;;  %v479_v45 = vpop.permute.xlu1 %478 }
 0x2e9   : > { %480 = vrot.lane.b32.xlu1 %v5235_v38, %s4967_s26  ;;  %v490_v46 = vsel %vm276_vm2, %v479_v45, 0.0 }
 0x2eb   : > { %v4775_v40 = vpop.eup %4774 }
 0x2ec   : > { %v5241_v41 = vsel %vm435_vm5, %v439_v39, %v4775_v40  ;;  %v4777_v42 = vpop.eup %4776 }
 0x2ed   : > { %482 = vrot.lane.b32.xlu1 %v5241_v41, %s4967_s26  ;;  %v5247_v44 = vsel %vm436_vm6, %v440_v43, %v4777_v42  ;;  %v858_v43 = vlaneseq }
 0x2f1   : > { %484 = vrot.lane.b32.xlu1 %v5247_v44, %s4967_s26 }
 0x315   : > { %491 = vadd.xlane.f32.xlu1 %v490_v46 }
 0x35b   : > { %v481_v47 = vpop.permute.xlu1 %480 }
 0x35c   : > { %v493_v48 = vsel %vm276_vm2, %v481_v47, 0.0 }
 0x35d   : > { %494 = vadd.xlane.f32.xlu0 %v493_v48  ;;  %v5342_v48 = vshrl.u32 %v858_v43, 7 }
 0x35f   : > { %v483_v49 = vpop.permute.xlu1 %482 }
 0x360   : > { %v496_v50 = vsel %vm276_vm2, %v483_v49, 0.0  ;;  %v5344_v49 = vand.u32 127, %v858_v43 }
 0x361   : > { %497 = vadd.xlane.f32.xlu1 %v496_v50 }
 0x362   : > { %vm862_vm7 = vcmp.gt.s32.totalorder %v5342_v48, %v5344_v49  ;;  %vm863_vm8 = vcmp.ge.s32.totalorder %v5342_v48, %v5344_v49 }
 0x363   : > { %v485_v51 = vpop.permute.xlu1 %484 }
 0x364   : > { %v499_v52 = vsel %vm276_vm2, %v485_v51, 0.0 }
 0x365   : > { %500 = vadd.xlane.f32.xlu0 %v499_v52 }
 0x3a2   : > { %v492_v55 = vpop.xlane.xlu1 %491 }
 0x3a3   : > { %4778 = vrcp.f32 %v492_v55 }
 0x3ad   : > { %v4779_v57 = vpop.eup %4778 }
 0x3ae   : > { %v503_v58 = vmul.f32 %v4779_v57, %v5220_v29 }
 0x3b0   : > { %515 = vrot.lane.b32.xlu1 %v503_v58, %s4967_s26 }
 0x3ea   : > { %v495_v60 = vpop.xlane.xlu0 %494 }
 0x3eb   : > { %4780 = vrcp.f32 %v495_v60 }
 0x3ec   : > { %4782 = vpow2.f32 %v4255_v59 }
 0x3ee   : > { %v498_v61 = vpop.xlane.xlu1 %497 }
 0x3ef   : > { %4784 = vrcp.f32 %v498_v61 }
 0x3f2   : > { %v501_v62 = vpop.xlane.xlu0 %500 }
 0x3f3   : > { %4786 = vrcp.f32 %v501_v62 }
 0x3f5   : > { %v4781_v63 = vpop.eup %4780 }
 0x3f6   : > { %v4783_v0 = vpop.eup %4782  ;;  %v505_v1 = vmul.f32 %v4781_v63, %v5235_v38 }
 0x3f7   : > { %v421_v3 = vadd.f32 1.0, %v4783_v0 }
 0x3f8   : > { %590 = vrot.lane.b32.xlu0 %v505_v1, %s4967_s26 }
 0x3f9   : > { %v4785_v2 = vpop.eup %4784  ;;  %4788 = vrcp.f32 %v421_v3 }
 0x3fa   : > { %v507_v4 = vmul.f32 %v4785_v2, %v5241_v41 }
 0x3fc   : > { %400 = vrot.lane.b32.xlu0 %v5212_v24, %s4969_s6  ;;  %665 = vrot.lane.b32.xlu1 %v507_v4, %s4967_s26  ;;  %s5658_s6 = scalar_lea.hbm %s5713_s5, %s4313_s12 }
 0x3fd   : > { %v4787_v5 = vpop.eup %4786 }
 0x3fe   : > { %v509_v6 = vmul.f32 %v4787_v5, %v5247_v44 }
 0x400   : > { %406 = vrot.lane.b32.xlu0 %v5212_v24, %s4970_s10  ;;  %740 = vrot.lane.b32.xlu1 %v509_v6, %s4967_s26  ;;  %s4869_s10 = scalar_lea.vmem %s5660_s30, 128 }
 0x401   : > { %p4870_p4 = scmp.ne.s32.totalorder %s5660_s30, %s4869_s10 }
 0x403   : > { %v5275_v7 = vpop.eup %4788  ;;  %p4871_p6 = pnand %p4870_p4, %p5103_p10 }
 0x404   : > { %403 = vrot.lane.b32.xlu1 %v5212_v24, %s4971_s11  ;;  %v1150_v46 = vsub.f32 0.0, %v5275_v7 }
 0x405   : > { %p4872_p8 = pneg %p4871_p6 }
 0x408   : > { %836 = vperm.xlu1 %4766, %v5275_v7  }
 0x422   : > { %v5280_v9 = vpop.permute.xlu1 %515 }
 0x423   : > { %4428 = vmatmul.mubr.msk.f32.vlgmr.msra.gmra.mrb[2].mxu0 %vm276_vm2, %v5280_v9 }
 0x424   : > { %4441 = vmatpush3.msra.mxu0 %v5278_v8  ;;  %4442 = vmatprep.mubr.msk.f32.mxu0 %vm4962_vm1, %v4963_v13 }
 0x425   : > { %4450 = vmatprep.subr.mxu0 %v4963_v13 }
 0x46a   : > { %v5290_v12 = vpop.permute.xlu0 %590 }
 0x46b   : > { %4433 = vmatmul.mubr.msk.f32.vlgmr.msra.gmra.mrb[0].mxu1 %vm276_vm2, %v5290_v12 }
 0x46c   : > { %4436 = vmatpush3.msra.mxu1 %v5288_v11  ;;  %4437 = vmatprep.mubr.msk.f32.mxu1 %vm4962_vm1, %v4963_v13 }
 0x46d   : > { %4445 = vmatprep.subr.mxu1 %v4963_v13 }
 0x46e   : > { %v401_v14 = vpop.permute.xlu0 %400  ;;  %v5298_v15 = vpop.permute.xlu1 %665 }
 0x46f   : > { %v4256_v16 = vmul.f32 -1.442695, %v401_v14  ;;  %4438 = vmatmul.mubr.msk.f32.vlgmr.msra.gmra.mrb[2].mxu1 %vm276_vm2, %v5298_v15 }
 0x470   : > { %4447 = vmatprep.mubr.msk.f32.mxu1 %vm4962_vm1, %v4963_v13 }
 0x471   : > { %4790 = vpow2.f32 %v4256_v16 }
 0x472   : > { %v407_v17 = vpop.permute.xlu0 %406  ;;  %v5304_v18 = vpop.permute.xlu1 %740 }
 0x473   : > { %v4258_v19 = vmul.f32 -1.442695, %v407_v17  ;;  %4446 = vmatpush3.xpose.msk.msra.mxu1 %vm276_vm2, %v5280_v9  ;;  %4443 = vmatmul.mubr.msk.f32.vlgmr.msra.gmra.mrb[4].mxu0 %vm276_vm2, %v5304_v18 }
 0x474   : > { %4451 = vmatpush3.xpose.msk.msra.mxu0 %vm276_vm2, %v5290_v12  ;;  %4455 = vmatprep.subr.mxu1 %v4963_v13 }
 0x475   : > { %4792 = vpow2.f32 %v4258_v19  ;;  %4452 = vmatprep.mubr.msk.f32.mxu0 %vm4962_vm1, %v4963_v13  ;;  %4460 = vmatprep.subr.mxu0 %v4963_v13 }
 0x476   : > { %4448 = vmatmul.mubr.msk.f32.vlgmr.msra.gmra.mrb[4].mxu1 %vm276_vm2, %v5280_v9  ;;  %v404_v20 = vpop.permute.xlu1 %403 }
 0x477   : > { %v4257_v21 = vmul.f32 -1.442695, %v404_v20  ;;  %4456 = vmatpush3.xpose.msk.msra.mxu1 %vm276_vm2, %v5298_v15  ;;  %4453 = vmatmul.mubr.msk.f32.vlgmr.msra.gmra.mrb[6].mxu0 %vm276_vm2, %v5290_v12 }
 0x478   : > { %4461 = vmatpush3.xpose.msk.msra.mxu0 %vm276_vm2, %v5304_v18  ;;  %4457 = vmatprep.mubr.msk.f32.mxu1 %vm4962_vm1, %v4963_v13 }
 0x479   : > { %4794 = vpow2.f32 %v4257_v21  ;;  %4462 = vmatprep.mubr.msk.f32.mxu0 %vm4962_vm1, %v4963_v13  ;;  %4465 = vmatprep.subr.mxu1 %v4963_v13 }
 0x47a   : > { %4458 = vmatmul.mubr.msk.f32.vlgmr.msra.gmra.mrb[6].mxu1 %vm276_vm2, %v5298_v15  ;;  %4470 = vmatprep.subr.mxu0 %v4963_v13 }
 0x47b   : > { %v4791_v22 = vpop.eup %4790  ;;  %4463 = vmatmul.mubr.msk.f32.vlgmr.msra.gmra.mrb[8].mxu0 %vm276_vm2, %v5304_v18  ;;  %4467 = vmatprep.mubr.msk.f32.mxu1 %vm4962_vm1, %v4963_v13 }
 0x47c   : > { %v422_v23 = vadd.f32 1.0, %v4791_v22  ;;  %4472 = vmatprep.mubr.msk.f32.mxu0 %vm4962_vm1, %v4963_v13 }
 0x47e   : > { %4796 = vrcp.f32 %v422_v23 }
 0x47f   : > { %v4793_v25 = vpop.eup %4792 }
 0x480   : > { %v424_v26 = vadd.f32 1.0, %v4793_v25 }
 0x482   : > { %4798 = vrcp.f32 %v424_v26 }
 0x483   : > { %v4795_v27 = vpop.eup %4794 }
 0x484   : > { %v423_v28 = vadd.f32 1.0, %v4795_v27 }
 0x486   : > { %4800 = vrcp.f32 %v423_v28 }
 0x487   : > { %v837_v3 = vpop.permute.xlu1 %836 }
 0x488   : > { %v4797_v31 = vpop.eup %4796 }
 0x489   : > { %841 = vperm.xlu0 %4767, %v4797_v31   ;;  %v1151_v53 = vsub.f32 0.0, %v4797_v31 }
 0x48c   : > { %v4799_v34 = vpop.eup %4798 }
 0x48d   : > { %851 = vperm.xlu0 %4767, %v4799_v34   ;;  %v1153_v61 = vsub.f32 0.0, %v4799_v34 }
 0x490   : > { %v4801_v35 = vpop.eup %4800 }
 0x491   : > { %846 = vperm.xlu1 %4766, %v4801_v35   ;;  %v1152_v52 = vsub.f32 0.0, %v4801_v35 }
 0x4f6   : > { %v585_v36 = vpop.f32.mrb[2].mxu0 }
 0x4f7   : > { %818 = vrot.lane.b32.xlu1 %v585_v36, %s4972_s7  ;;  %v4429_v37 = vpop.f32.mrb[3].mxu0 }
 0x508   : > { %v842_v14 = vpop.permute.xlu0 %841 }
 0x50c   : > { %v852_v16 = vpop.permute.xlu0 %851 }
 0x510   : > { %v847_v4 = vpop.permute.xlu1 %846 }
 0x53e   : > { %v660_v39 = vpop.f32.mrb[0].mxu1 }
 0x53f   : > { %v4434_v40 = vpop.f32.mrb[1].mxu1  ;;  %820 = vrot.lane.b32.xlu1 %v660_v39, %s4972_s7 }
 0x542   : > { %v735_v42 = vpop.f32.mrb[2].mxu1 }
 0x543   : > { %822 = vrot.lane.b32.xlu0 %v735_v42, %s4972_s7  ;;  %v4439_v45 = vpop.f32.mrb[3].mxu1 }
 0x546   : > { %v810_v47 = vpop.f32.mrb[4].mxu0 }
 0x547   : > { %1156 = vperm.xlu0 %4767, %v1150_v46   ;;  %824 = vrot.lane.b32.xlu1 %v810_v47, %s4972_s7  ;;  %v4444_v50 = vpop.f32.mrb[5].mxu0 }
 0x549   : > { %v930_v51 = vpop.f32.mrb[4].mxu1 }
 0x54a   : > { %v4449_v55 = vpop.f32.mrb[5].mxu1  ;;  %v1000_v57 = vpop.f32.mrb[6].mxu0 }
 0x54b   : > { %v1147_v58 = vsel %vm862_vm7, %v1000_v57, 0.0  ;;  %1166 = vperm.xlu0 %4767, %v1152_v52   ;;  %1161 = vperm.xlu1 %4766, %v1151_v53   ;;  %v4454_v59 = vpop.f32.mrb[7].mxu0 }
 0x54d   : > { %v1070_v60 = vpop.f32.mrb[6].mxu1 }
 0x54e   : > { %v1148_v62 = vsel %vm862_vm7, %v1070_v60, 0.0  ;;  %v4459_v63 = vpop.f32.mrb[7].mxu1  ;;  %v1140_v0 = vpop.f32.mrb[8].mxu0 }
 0x54f   : > { %v1149_v1 = vsel %vm862_vm7, %v1140_v0, 0.0  ;;  %1171 = vperm.xlu1 %4766, %v1153_v61   ;;  %v4464_v2 = vpop.f32.mrb[9].mxu0 }
 0x569   : > { %v819_v5 = vpop.permute.xlu1 %818 }
 0x56a   : > { %v830_v6 = vsub.f32 %v5212_v24, %v819_v5 }
 0x56c   : > { %v5359_v7 = vmul.f32 %v837_v3, %v830_v6 }
 0x56e   : > { %1179 = vrot.lane.b32.xlu0 %v5359_v7, %s4972_s7 }
 0x5b1   : > { %v821_v17 = vpop.permute.xlu1 %820 }
 0x5b2   : > { %v831_v19 = vsub.f32 %v5224_v30, %v821_v17 }
 0x5b4   : > { %v5364_v20 = vmul.f32 %v842_v14, %v831_v19 }
 0x5b5   : > { %v823_v21 = vpop.permute.xlu0 %822 }
 0x5b6   : > { %v832_v22 = vsub.f32 %v5229_v33, %v823_v21  ;;  %1256 = vrot.lane.b32.xlu1 %v5364_v20, %s4972_s7  ;;  %v1146_v33 = vsel %vm862_vm7, %v930_v51, 0.0 }
 0x5b8   : > { %v5369_v23 = vmul.f32 %v847_v4, %v832_v22 }
 0x5b9   : > { %v825_v24 = vpop.permute.xlu1 %824 }
 0x5ba   : > { %v833_v25 = vsub.f32 %v5227_v32, %v825_v24  ;;  %1333 = vrot.lane.b32.xlu0 %v5369_v23, %s4972_s7 }
 0x5bc   : > { %v5374_v26 = vmul.f32 %v852_v16, %v833_v25 }
 0x5be   : > { %1410 = vrot.lane.b32.xlu1 %v5374_v26, %s4972_s7 }
 0x5c6   : > { %v1157_v30 = vpop.permute.xlu0 %1156 }
 0x5c7   : > { %v1174_v31 = vmul.f32 %v1157_v30, %v1146_v33 }
 0x5ca   : > { %v1167_v27 = vpop.permute.xlu0 %1166  ;;  %v1162_v32 = vpop.permute.xlu1 %1161 }
 0x5cb   : > { %v1176_v28 = vmul.f32 %v1167_v27, %v1148_v62  ;;  %v1175_v36 = vmul.f32 %v1162_v32, %v1147_v58 }
 0x5ce   : > { %v1172_v35 = vpop.permute.xlu1 %1171 }
 0x5cf   : > { %v1177_v40 = vmul.f32 %v1172_v35, %v1149_v1 }
 0x5e0   : > { %v1180_v34 = vpop.permute.xlu0 %1179 }
 0x5e1   : > { %4466 = vmatpush3.msra.mxu1 %v1180_v34 }
 0x5e2   : > { %4468 = vmatmul.mubr.msk.f32.vlgmr.msra.gmra.mrb[8].mxu1 %vm276_vm2, %v1174_v31  ;;  %4475 = vmatprep.subr.mxu1 %v4963_v13 }
 0x5e3   : > { %4477 = vmatprep.mubr.msk.f32.mxu1 %vm4962_vm1, %v4963_v13 }
 0x628   : > { %v1257_v37 = vpop.permute.xlu1 %1256 }
 0x629   : > { %4471 = vmatpush3.msra.mxu0 %v1257_v37 }
 0x62a   : > { %4473 = vmatmul.mubr.msk.f32.vlgmr.msra.gmra.mrb[10].mxu0 %vm276_vm2, %v1175_v36  ;;  %4480 = vmatprep.subr.mxu0 %v4963_v13 }
 0x62b   : > { %4482 = vmatprep.mubr.msk.f32.mxu0 %vm4962_vm1, %v4963_v13 }
 0x62c   : > { %v1334_v39 = vpop.permute.xlu0 %1333 }
 0x62d   : > { %4476 = vmatpush3.msra.mxu1 %v1334_v39 }
 0x62e   : > { %4478 = vmatmul.mubr.msk.f32.vlgmr.msra.gmra.mrb[10].mxu1 %vm276_vm2, %v1176_v28  ;;  %4485 = vmatprep.subr.mxu1 %v4963_v13 }
 0x62f   : > { %4486 = vmatpush3.msra.mxu1 %v1174_v31  ;;  %4487 = vmatprep.mubr.msk.f32.mxu1 %vm4962_vm1, %v4963_v13 }
 0x630   : > { %v1411_v42 = vpop.permute.xlu1 %1410  ;;  %4495 = vmatprep.subr.mxu1 %v4963_v13 }
 0x631   : > { %4481 = vmatpush3.msra.mxu0 %v1411_v42 }
 0x632   : > { %4483 = vmatmul.mubr.msk.f32.vlgmr.msra.gmra.mrb[12].mxu0 %vm276_vm2, %v1177_v40  ;;  %4488 = vmatmul.mubr.msk.f32.vlgmr.msra.gmra.mrb[12].mxu1 %vm276_vm2, %v1174_v31 }
 0x633   : > { %4490 = vmatprep.subr.mxu0 %v4963_v13  ;;  %4496 = vmatpush3.msra.mxu1 %v1176_v28 }
 0x634   : > { %4491 = vmatpush3.msra.mxu0 %v1175_v36  ;;  %4492 = vmatprep.mubr.msk.f32.mxu0 %vm4962_vm1, %v4963_v13 }
 0x635   : > { %4497 = vmatprep.mubr.msk.f32.mxu1 %vm4962_vm1, %v4963_v13  ;;  %4500 = vmatprep.subr.mxu0 %v4963_v13 }
 0x636   : > { %4493 = vmatmul.mubr.msk.f32.vlgmr.msra.gmra.mrb[14].mxu0 %vm276_vm2, %v1175_v36  ;;  %4498 = vmatmul.mubr.msk.f32.vlgmr.msra.gmra.mrb[14].mxu1 %vm276_vm2, %v1176_v28 }
 0x637   : > { %4501 = vmatpush3.msra.mxu0 %v1177_v40  ;;  %4502 = vmatprep.mubr.msk.f32.mxu0 %vm4962_vm1, %v4963_v13 }
 0x638   : > { %4505 = vmatprep.subr.mxu1 %v4963_v13  ;;  %4507 = vmatprep.mubr.msk.f32.mxu1 %vm4962_vm1, %v4963_v13 }
 0x639   : > { %4510 = vmatprep.subr.mxu0 %v4963_v13 }
 0x63a   : > { %4503 = vmatmul.mubr.msk.f32.vlgmr.msra.gmra.mrb[16].mxu0 %vm276_vm2, %v1177_v40 }
 0x63b   : > { %4512 = vmatprep.mubr.msk.f32.mxu0 %vm4962_vm1, %v4963_v13 }
 0x6b5   : > { %v1251_v43 = vpop.f32.mrb[8].mxu1 }
 0x6b6   : > { %1490 = vrot.lane.b32.xlu0 %v1251_v43, %s4972_s7  ;;  %v4469_v45 = vpop.f32.mrb[9].mxu1 }
 0x6fd   : > { %v1328_v46 = vpop.f32.mrb[10].mxu0 }
 0x6fe   : > { %1492 = vrot.lane.b32.xlu1 %v1328_v46, %s4972_s7  ;;  %v4474_v47 = vpop.f32.mrb[11].mxu0 }
 0x701   : > { %v1405_v50 = vpop.f32.mrb[10].mxu1 }
 0x702   : > { %1494 = vrot.lane.b32.xlu0 %v1405_v50, %s4972_s7  ;;  %v4479_v51 = vpop.f32.mrb[11].mxu1  ;;  %v454_v50 = vsel %vm276_vm2, %v5220_v29, 0.0 }
 0x703   : > { %v460_v51 = vsel %vm276_vm2, %v5241_v41, 0.0 }
 0x705   : > { %v1482_v52 = vpop.f32.mrb[12].mxu0  ;;  %v1572_v53 = vpop.f32.mrb[12].mxu1 }
 0x706   : > { %v4489_v55 = vpop.f32.mrb[13].mxu1  ;;  %1496 = vrot.lane.b32.xlu1 %v1482_v52, %s4972_s7  ;;  %v4484_v57 = vpop.f32.mrb[13].mxu0 }
 0x707   : > { %v457_v55 = vsel %vm276_vm2, %v5235_v38, 0.0 }
 0x709   : > { %v1642_v58 = vpop.f32.mrb[14].mxu0  ;;  %v1712_v59 = vpop.f32.mrb[14].mxu1 }
 0x70a   : > { %v4494_v60 = vpop.f32.mrb[15].mxu0  ;;  %v4499_v61 = vpop.f32.mrb[15].mxu1 }
 0x70d   : > { %v1782_v62 = vpop.f32.mrb[16].mxu0 }
 0x70e   : > { %v4504_v63 = vpop.f32.mrb[17].mxu0 }
 0x728   : > { %v1491_v0 = vpop.permute.xlu0 %1490 }
 0x729   : > { %v5418_v1 = vadd.f32 %v1491_v0, %v5359_v7 }
 0x72b   : > { %1787 = vrot.lane.b32.xlu0 %v5418_v1, %s4972_s7 }
 0x770   : > { %v1493_v2 = vpop.permute.xlu1 %1492 }
 0x771   : > { %v5423_v3 = vadd.f32 %v1493_v2, %v5364_v20 }
 0x773   : > { %1864 = vrot.lane.b32.xlu1 %v5423_v3, %s4972_s7 }
 0x774   : > { %v1495_v4 = vpop.permute.xlu0 %1494 }
 0x775   : > { %v5428_v5 = vadd.f32 %v1495_v4, %v5369_v23 }
 0x777   : > { %1941 = vrot.lane.b32.xlu0 %v5428_v5, %s4972_s7 }
 0x778   : > { %v1497_v6 = vpop.permute.xlu1 %1496 }
 0x779   : > { %v5433_v7 = vadd.f32 %v1497_v6, %v5374_v26 }
 0x77b   : > { %2018 = vrot.lane.b32.xlu1 %v5433_v7, %s4972_s7 }
 0x79d   : > { %v1788_v14 = vpop.permute.xlu0 %1787 }
 0x79e   : > { %4506 = vmatpush3.msra.mxu1 %v1788_v14 }
 0x79f   : > { %4508 = vmatmul.mubr.msk.f32.vlgmr.msra.gmra.mrb[16].mxu1 %vm276_vm2, %v1572_v53  ;;  %4515 = vmatprep.subr.mxu1 %v4963_v13 }
 0x7a0   : > { %4517 = vmatprep.mubr.msk.f32.mxu1 %vm4962_vm1, %v4963_v13 }
 0x7e5   : > { %v1865_v16 = vpop.permute.xlu1 %1864 }
 0x7e6   : > { %4511 = vmatpush3.msra.mxu0 %v1865_v16 }
 0x7e7   : > { %4513 = vmatmul.mubr.msk.f32.vlgmr.msra.gmra.mrb[18].mxu0 %vm276_vm2, %v1642_v58  ;;  %4520 = vmatprep.subr.mxu0 %v4963_v13 }
 0x7e8   : > { %4522 = vmatprep.mubr.msk.f32.mxu0 %vm4962_vm1, %v4963_v13 }
 0x7e9   : > { %v1942_v17 = vpop.permute.xlu0 %1941 }
 0x7ea   : > { %4516 = vmatpush3.msra.mxu1 %v1942_v17 }
 0x7eb   : > { %4518 = vmatmul.mubr.msk.f32.vlgmr.msra.gmra.mrb[18].mxu1 %vm276_vm2, %v1712_v59  ;;  %4525 = vmatprep.subr.mxu1 %v4963_v13 }
 0x7ec   : > { %4526 = vmatpush3.msra.mxu1 %v1572_v53  ;;  %4527 = vmatprep.mubr.msk.f32.mxu1 %vm4962_vm1, %v4963_v13 }
 0x7ed   : > { %v2019_v19 = vpop.permute.xlu1 %2018  ;;  %4535 = vmatprep.subr.mxu1 %v4963_v13 }
 0x7ee   : > { %4521 = vmatpush3.msra.mxu0 %v2019_v19 }
 0x7ef   : > { %4523 = vmatmul.mubr.msk.f32.vlgmr.msra.gmra.mrb[20].mxu0 %vm276_vm2, %v1782_v62  ;;  %4528 = vmatmul.mubr.msk.f32.vlgmr.msra.gmra.mrb[20].mxu1 %vm276_vm2, %v1572_v53  ;;  %v463_v53 = vsel %vm276_vm2, %v5247_v44, 0.0 }
 0x7f0   : > { %4530 = vmatprep.subr.mxu0 %v4963_v13  ;;  %4536 = vmatpush3.msra.mxu1 %v1712_v59 }
 0x7f1   : > { %4531 = vmatpush3.msra.mxu0 %v1642_v58  ;;  %4532 = vmatprep.mubr.msk.f32.mxu0 %vm4962_vm1, %v4963_v13 }
 0x7f2   : > { %4537 = vmatprep.mubr.msk.f32.mxu1 %vm4962_vm1, %v4963_v13  ;;  %4540 = vmatprep.subr.mxu0 %v4963_v13 }
 0x7f3   : > { %4533 = vmatmul.mubr.msk.f32.vlgmr.msra.gmra.mrb[22].mxu0 %vm276_vm2, %v1642_v58  ;;  %4538 = vmatmul.mubr.msk.f32.vlgmr.msra.gmra.mrb[22].mxu1 %vm276_vm2, %v1712_v59 }
 0x7f4   : > { %4541 = vmatpush3.msra.mxu0 %v1782_v62  ;;  %4542 = vmatprep.mubr.msk.f32.mxu0 %vm4962_vm1, %v4963_v13 }
 0x7f5   : > { %4545 = vmatprep.subr.mxu1 %v4963_v13  ;;  %4547 = vmatprep.mubr.msk.f32.mxu1 %vm4962_vm1, %v4963_v13 }
 0x7f6   : > { %4550 = vmatprep.subr.mxu0 %v4963_v13 }
 0x7f7   : > { %4543 = vmatmul.mubr.msk.f32.vlgmr.msra.gmra.mrb[24].mxu0 %vm276_vm2, %v1782_v62 }
 0x7f8   : > { %4552 = vmatprep.mubr.msk.f32.mxu0 %vm4962_vm1, %v4963_v13 }
 0x872   : > { %v1859_v20 = vpop.f32.mrb[16].mxu1 }
 0x873   : > { %2098 = vrot.lane.b32.xlu0 %v1859_v20, %s4972_s7  ;;  %v4509_v21 = vpop.f32.mrb[17].mxu1 }
 0x8ba   : > { %v1936_v22 = vpop.f32.mrb[18].mxu0 }
 0x8bb   : > { %2100 = vrot.lane.b32.xlu1 %v1936_v22, %s4972_s7  ;;  %v4514_v23 = vpop.f32.mrb[19].mxu0 }
 0x8be   : > { %v2013_v24 = vpop.f32.mrb[18].mxu1 }
 0x8bf   : > { %2102 = vrot.lane.b32.xlu0 %v2013_v24, %s4972_s7  ;;  %v4519_v25 = vpop.f32.mrb[19].mxu1 }
 0x8c2   : > { %v2090_v26 = vpop.f32.mrb[20].mxu0  ;;  %v2180_v30 = vpop.f32.mrb[20].mxu1 }
 0x8c3   : > { %v4529_v27 = vpop.f32.mrb[21].mxu1  ;;  %2104 = vrot.lane.b32.xlu1 %v2090_v26, %s4972_s7  ;;  %v4524_v28 = vpop.f32.mrb[21].mxu0 }
 0x8c6   : > { %v2250_v33 = vpop.f32.mrb[22].mxu0  ;;  %v2320_v31 = vpop.f32.mrb[22].mxu1 }
 0x8c7   : > { %v4534_v34 = vpop.f32.mrb[23].mxu0  ;;  %v4539_v32 = vpop.f32.mrb[23].mxu1 }
 0x8ca   : > { %v2390_v35 = vpop.f32.mrb[24].mxu0 }
 0x8cb   : > { %v4544_v36 = vpop.f32.mrb[25].mxu0 }
 0x8e5   : > { %v2099_v37 = vpop.permute.xlu0 %2098 }
 0x8e6   : > { %v5474_v39 = vadd.f32 %v2099_v37, %v5418_v1 }
 0x8e8   : > { %2395 = vrot.lane.b32.xlu0 %v5474_v39, %s4972_s7 }
 0x92d   : > { %v2101_v40 = vpop.permute.xlu1 %2100 }
 0x92e   : > { %v5479_v42 = vadd.f32 %v2101_v40, %v5423_v3 }
 0x930   : > { %2472 = vrot.lane.b32.xlu1 %v5479_v42, %s4972_s7 }
 0x931   : > { %v2103_v43 = vpop.permute.xlu0 %2102 }
 0x932   : > { %v5484_v45 = vadd.f32 %v2103_v43, %v5428_v5 }
 0x934   : > { %2549 = vrot.lane.b32.xlu0 %v5484_v45, %s4972_s7 }
 0x935   : > { %v2105_v46 = vpop.permute.xlu1 %2104 }
 0x936   : > { %v5489_v47 = vadd.f32 %v2105_v46, %v5433_v7 }
 0x938   : > { %2626 = vrot.lane.b32.xlu1 %v5489_v47, %s4972_s7 }
 0x953   : > { %455 = vadd.xlane.f32.xlu0 %v454_v50 }
 0x957   : > { %461 = vadd.xlane.f32.xlu0 %v460_v51 }
 0x95a   : > { %v2396_v52 = vpop.permute.xlu0 %2395 }
 0x95b   : > { %464 = vadd.xlane.f32.xlu0 %v463_v53  ;;  %4546 = vmatpush3.msra.mxu1 %v2396_v52 }
 0x95c   : > { %4548 = vmatmul.mubr.msk.f32.vlgmr.msra.gmra.mrb[24].mxu1 %vm276_vm2, %v2180_v30  ;;  %458 = vadd.xlane.f32.xlu1 %v457_v55 }
 0x95d   : > { %4555 = vmatprep.subr.mxu1 %v4963_v13  ;;  %4557 = vmatprep.mubr.msk.f32.mxu1 %vm4962_vm1, %v4963_v13 }
 0x9a2   : > { %v2473_v57 = vpop.permute.xlu1 %2472 }
 0x9a3   : > { %4551 = vmatpush3.msra.mxu0 %v2473_v57 }
 0x9a4   : > { %4553 = vmatmul.mubr.msk.f32.vlgmr.msra.gmra.mrb[26].mxu0 %vm276_vm2, %v2250_v33  ;;  %4560 = vmatprep.subr.mxu0 %v4963_v13 }
 0x9a5   : > { %4562 = vmatprep.mubr.msk.f32.mxu0 %vm4962_vm1, %v4963_v13 }
 0x9a6   : > { %v2550_v58 = vpop.permute.xlu0 %2549 }
 0x9a7   : > { %4556 = vmatpush3.msra.mxu1 %v2550_v58 }
 0x9a8   : > { %4558 = vmatmul.mubr.msk.f32.vlgmr.msra.gmra.mrb[26].mxu1 %vm276_vm2, %v2320_v31  ;;  %4565 = vmatprep.subr.mxu1 %v4963_v13 }
 0x9a9   : > { %4567 = vmatprep.mubr.msk.f32.mxu1 %vm4962_vm1, %v4963_v13 }
 0x9aa   : > { %v2627_v59 = vpop.permute.xlu1 %2626 }
 0x9ab   : > { %4561 = vmatpush3.msra.mxu0 %v2627_v59 }
 0x9ac   : > { %4563 = vmatmul.mubr.msk.f32.vlgmr.msra.gmra.mrb[28].mxu0 %vm276_vm2, %v2390_v35  ;;  %4570 = vmatprep.subr.mxu0 %v4963_v13 }
 0x9ad   : > { %4572 = vmatprep.mubr.msk.f32.mxu0 %vm4962_vm1, %v4963_v13 }
 0x9ae   : > { %4566 = vmatpush3.xpose.msk.msra.mxu1 %vm276_vm2, %v5280_v9 }
 0x9af   : > { %4575 = vmatprep.subr.mxu1 %v4963_v13 }
 0x9b2   : > { %4571 = vmatpush3.xpose.msk.msra.mxu0 %vm276_vm2, %v5290_v12 }
 0x9b3   : > { %4580 = vmatprep.subr.mxu0 %v4963_v13 }
 0x9e0   : > { %v456_v60 = vpop.xlane.xlu0 %455 }
 0x9e1   : > { %4802 = vrcp.f32 %v456_v60 }
 0x9e4   : > { %v462_v61 = vpop.xlane.xlu0 %461 }
 0x9e5   : > { %4804 = vrcp.f32 %v462_v61 }
 0x9e8   : > { %v465_v62 = vpop.xlane.xlu0 %464 }
 0x9e9   : > { %v459_v63 = vpop.xlane.xlu1 %458 }
 0x9ea   : > { %4806 = vrcp.f32 %v459_v63  ;;  %v4058_v63 = vld [vmem:[#allocation6 + $0x8] sm:$0xff] }
 0x9eb   : > { %v4803_v0 = vpop.eup %4802  ;;  %4808 = vrcp.f32 %v465_v62  ;;  %v4057_v62 = vld [vmem:[#allocation6] sm:$0xff] }
 0x9ec   : > { %v5524_v1 = vmul.f32 %v4803_v0, %v5220_v29 }
 0x9ee   : > { %4568 = vmatmul.mubr.msk.f32.vlgmr.msra.gmra.mrb[28].mxu1 %vm276_vm2, %v5524_v1 }
 0x9ef   : > { %v4805_v2 = vpop.eup %4804  ;;  %4576 = vmatpush3.xpose.msk.msra.mxu1 %vm276_vm2, %v5298_v15  ;;  %4577 = vmatprep.mubr.msk.f32.mxu1 %vm4962_vm1, %v4963_v13 }
 0x9f0   : > { %v5533_v3 = vmul.f32 %v4805_v2, %v5241_v41  ;;  %4585 = vmatprep.subr.mxu1 %v4963_v13 }
 0x9f2   : > { %4578 = vmatmul.mubr.msk.f32.vlgmr.msra.gmra.mrb[30].mxu1 %vm276_vm2, %v5533_v3 }
 0x9f3   : > { %4587 = vmatprep.mubr.msk.f32.mxu1 %vm4962_vm1, %v4963_v13 }
 0x9f4   : > { %v4807_v29 = vpop.eup %4806 }
 0x9f5   : > { %v5541_v4 = vmul.f32 %v4807_v29, %v5235_v38  ;;  %v4809_v5 = vpop.eup %4808 }
 0x9f6   : > { %v5550_v41 = vmul.f32 %v4809_v5, %v5247_v44 }
 0x9f7   : > { %4573 = vmatmul.mubr.msk.f32.vlgmr.msra.gmra.mrb[30].mxu0 %vm276_vm2, %v5541_v4 }
 0x9f8   : > { %4581 = vmatpush3.xpose.msk.msra.mxu0 %vm276_vm2, %v5304_v18  ;;  %4582 = vmatprep.mubr.msk.f32.mxu0 %vm4962_vm1, %v4963_v13 }
 0x9f9   : > { %4590 = vmatprep.subr.mxu0 %v4963_v13 }
 0x9fb   : > { %4583 = vmatmul.mubr.msk.f32.vlgmr.msra.gmra.mrb[32].mxu0 %vm276_vm2, %v5550_v41 }
 0x9fc   : > { %4592 = vmatprep.mubr.msk.f32.mxu0 %vm4962_vm1, %v4963_v13 }
 0xa2f   : > { %v2467_v38 = vpop.f32.mrb[24].mxu1 }
 0xa30   : > { %v4549_v6 = vpop.f32.mrb[25].mxu1  ;;  %2706 = vrot.lane.b32.xlu1 %v2467_v38, %s4972_s7 }
 0xa77   : > { %v2544_v7 = vpop.f32.mrb[26].mxu0 }
 0xa78   : > { %2708 = vrot.lane.b32.xlu0 %v2544_v7, %s4972_s7  ;;  %v4554_v14 = vpop.f32.mrb[27].mxu0 }
 0xa7b   : > { %v2621_v16 = vpop.f32.mrb[26].mxu1 }
 0xa7c   : > { %v4559_v17 = vpop.f32.mrb[27].mxu1  ;;  %2710 = vrot.lane.b32.xlu1 %v2621_v16, %s4972_s7 }
 0xa7f   : > { %v2698_v44 = vpop.f32.mrb[28].mxu0 }
 0xa80   : > { %2712 = vrot.lane.b32.xlu1 %v2698_v44, %s4972_s7  ;;  %v4564_v19 = vpop.f32.mrb[29].mxu0 }
 0xa81   : > { %v4810_v19 = vld [vmem:[%s5162_s24] sm:$0xff]  ;;  %s4873_s24 = sshll.u32 %s4976_s17, 4  ;;  %s4874_s24 = int_to_ptr.vmem [resolvable:$false] %s4873_s24 }
 0xa82   : > { %s4875_s11 = scalar_lea.vmem %s4874_s24, 256  ;;  %p4876_p12 = scmp.lt.s32.totalorder %s5660_s30, %s4874_s24 }
 0xa83   : > { %p4877_p11 = scmp.lt.s32.totalorder %s4875_s11, %s4869_s10 }
 0xa85   : > { %p4878_p0 = por %p4877_p11, %p4876_p12 }
 0xa87   : > { %p4879_p5 = pnand %p4878_p0, %p4872_p8 }
 0xaa2   : > { %v2707_v20 = vpop.permute.xlu1 %2706 }
 0xaa3   : > { %v2718_v21 = vadd.f32 %v2707_v20, %v5474_v39 }
 0xaa5   : > { %3021 = vrot.lane.b32.xlu0 %v2718_v21, %s4972_s7 }
 0xac1   : > { %v2791_v22 = vpop.f32.mrb[28].mxu1 }
 0xac2   : > { %v4569_v23 = vpop.f32.mrb[29].mxu1 }
 0xac5   : > { %v2937_v24 = vpop.f32.mrb[30].mxu1 }
 0xac6   : > { %v3018_v25 = vsel %vm863_vm8, %v2937_v24, 0.0  ;;  %v4579_v26 = vpop.f32.mrb[31].mxu1 }
 0xaca   : > { %v2864_v30 = vpop.f32.mrb[30].mxu0 }
 0xacb   : > { %v3017_v27 = vsel %vm863_vm8, %v2864_v30, 0.0  ;;  %v4574_v28 = vpop.f32.mrb[31].mxu0 }
 0xace   : > { %v3010_v33 = vpop.f32.mrb[32].mxu0 }
 0xacf   : > { %v3019_v31 = vsel %vm863_vm8, %v3010_v33, 0.0  ;;  %v4584_v34 = vpop.f32.mrb[33].mxu0 }
 0xaea   : > { %v2709_v32 = vpop.permute.xlu0 %2708 }
 0xaeb   : > { %v2719_v35 = vadd.f32 %v2709_v32, %v5479_v42  ;;  %v3016_v42 = vsel %vm863_vm8, %v2791_v22, 0.0 }
 0xaed   : > { %3098 = vrot.lane.b32.xlu1 %v2719_v35, %s4972_s7 }
 0xaee   : > { %v2711_v36 = vpop.permute.xlu1 %2710 }
 0xaef   : > { %v2720_v37 = vadd.f32 %v2711_v36, %v5484_v45 }
 0xaf1   : > { %3175 = vrot.lane.b32.xlu0 %v2720_v37, %s4972_s7 }
 0xaf2   : > { %v2713_v39 = vpop.permute.xlu1 %2712 }
 0xaf3   : > { %v2721_v40 = vadd.f32 %v2713_v39, %v5489_v47 }
 0xaf5   : > { %3252 = vrot.lane.b32.xlu1 %v2721_v40, %s4972_s7 }
 0xb0f   : > { %3821 = vxpose.xlu0.b32.start.end [1/1] (short) (narrow) %v5298_v15, 8 }
 0xb13   : > { %3715 = vxpose.xlu0.b32.start.end [1/1] (short) (narrow) %v5290_v12, 8 }
 0xb17   : > { %v3022_v43 = vpop.permute.xlu0 %3021 }
 0xb18   : > { %4586 = vmatpush3.msra.mxu1 %v3022_v43 }
 0xb19   : > { %4588 = vmatmul.mubr.msk.f32.vlgmr.msra.gmra.mrb[32].mxu1 %vm276_vm2, %v3016_v42  ;;  %4595 = vmatprep.subr.mxu1 %v4963_v13 }
 0xb1a   : > { %4597 = vmatprep.mubr.msk.f32.mxu1 %vm4962_vm1, %v4963_v13 }
 0xb5f   : > { %v3099_v45 = vpop.permute.xlu1 %3098 }
 0xb60   : > { %4591 = vmatpush3.msra.mxu0 %v3099_v45 }
 0xb61   : > { %4593 = vmatmul.mubr.msk.f32.vlgmr.msra.gmra.mrb[34].mxu0 %vm276_vm2, %v3017_v27  ;;  %4600 = vmatprep.subr.mxu0 %v4963_v13 }
 0xb62   : > { %4602 = vmatprep.mubr.msk.f32.mxu0 %vm4962_vm1, %v4963_v13 }
 0xb63   : > { %v3176_v12 = vpop.permute.xlu0 %3175 }
 0xb64   : > { %4596 = vmatpush3.msra.mxu1 %v3176_v12 }
 0xb65   : > { %4598 = vmatmul.mubr.msk.f32.vlgmr.msra.gmra.mrb[34].mxu1 %vm276_vm2, %v3018_v25  ;;  %4605 = vmatprep.subr.mxu1 %v4963_v13 }
 0xb66   : > { %4606 = vmatpush3.msra.mxu1 %v5255_v54  ;;  %4607 = vmatprep.mubr.msk.f32.mxu1 %vm4962_vm1, %v4963_v13 }
 0xb67   : > { %v3253_v15 = vpop.permute.xlu1 %3252  ;;  %4615 = vmatprep.subr.mxu1 %v4963_v13 }
 0xb68   : > { %4601 = vmatpush3.msra.mxu0 %v3253_v15 }
 0xb69   : > { %4603 = vmatmul.mubr.msk.f32.vlgmr.msra.gmra.mrb[36].mxu0 %vm276_vm2, %v3019_v31  ;;  %4608 = vmatmul.mubr.msk.f32.vlgmr.msra.gmra.mrb[32].mxu1 %vm276_vm2, %v5524_v1  ;;  %v4663_v1 = vpack.c.bf16 %v4058_v63, %v4057_v62 }
 0xb6a   : > { %4610 = vmatprep.subr.mxu0 %v4963_v13  ;;  %4616 = vmatpush3.msra.mxu1 %v5288_v11 }
 0xb6b   : > { %4611 = vmatpush3.msra.mxu0 %v5258_v56  ;;  %4612 = vmatprep.mubr.msk.f32.mxu0 %vm4962_vm1, %v4963_v13 }
 0xb6c   : > { %4617 = vmatprep.mubr.msk.f32.mxu1 %vm4962_vm1, %v4963_v13  ;;  %4625 = vmatprep.subr.mxu1 %v4963_v13 }
 0xb6d   : > { %4613 = vmatmul.mubr.msk.f32.vlgmr.msra.gmra.mrb[34].mxu0 %vm276_vm2, %v5541_v4  ;;  %4618 = vmatmul.mubr.msk.f32.vlgmr.msra.gmra.mrb[34].mxu1 %vm276_vm2, %v5533_v3 }
 0xb6e   : > { %4626 = vmatpush3.msra.mxu1 %v3022_v43  ;;  %4620 = vmatprep.subr.mxu0 %v4963_v13 }
 0xb6f   : > { %4621 = vmatpush3.msra.mxu0 %v5278_v8  ;;  %4622 = vmatprep.mubr.msk.f32.mxu0 %vm4962_vm1, %v4963_v13 }
 0xb70   : > { %4630 = vmatprep.subr.mxu0 %v4963_v13  ;;  %4627 = vmatprep.mubr.msk.f32.mxu1 %vm4962_vm1, %v4963_v13 }
 0xb71   : > { %4623 = vmatmul.mubr.msk.f32.vlgmr.msra.gmra.mrb[36].mxu0 %vm276_vm2, %v5550_v41  ;;  %4635 = vmatprep.subr.mxu1 %v4963_v13 }
 0xb72   : > { %4631 = vmatpush3.msra.mxu0 %v3099_v45  ;;  %4632 = vmatprep.mubr.msk.f32.mxu0 %vm4962_vm1, %v4963_v13 }
 0xb73   : > { %4640 = vmatprep.subr.mxu0 %v4963_v13 }
 0xb8f   : > { %v3837_v48 = vpop.trf.xlu0 }
 0xb93   : > { %v3731_v49 = vpop.trf.xlu0 }
 0xb94   : > { %4633 = vmatmul.mubr.msk.f32.vlgmr.msra.gmra.mrb[38].mxu0 %vm276_vm2, %v3731_v49 }
 0xb95   : > { %4641 = vmatpush3.msra.mxu0 %v3253_v15  ;;  %4642 = vmatprep.mubr.msk.f32.mxu0 %vm4962_vm1, %v4963_v13 }
 0xc3c   : > { %v3394_v46 = vpop.f32.mrb[32].mxu1 }
 0xc3d   : > { %v4609_v47 = vpop.f32.mrb[33].mxu1 }
 0xc40   : > { %v3464_v50 = vpop.f32.mrb[34].mxu0  ;;  %v3534_v51 = vpop.f32.mrb[34].mxu1 }
 0xc41   : > { %v4619_v52 = vpop.f32.mrb[35].mxu1  ;;  %4045 = vrot.lane.b32.xlu1 %v3534_v51, %s4973_s27  ;;  %4041 = vrot.lane.b32.xlu0 %v3464_v50, %s4974_s14  ;;  %v4614_v53 = vpop.f32.mrb[35].mxu0 }
 0xc44   : > { %v3604_v55 = vpop.f32.mrb[36].mxu0 }
 0xc45   : > { %4049 = vrot.lane.b32.xlu0 %v3604_v55, %s4975_s16  ;;  %v4624_v57 = vpop.f32.mrb[37].mxu0 }
 0xc63   : > { %3927 = vxpose.xlu0.b32.start.end [1/1] (short) (narrow) %v5304_v18, 8  ;;  %v4059_v18 = vld [vmem:[#allocation6 + $0x10] sm:$0xff] }
 0xc67   : > { %v3816_v5 = vpop.f32.mrb[38].mxu0 }
 0xc68   : > { %v4634_v41 = vpop.f32.mrb[39].mxu0  ;;  %v4033_v38 = vadd.f32 %v3816_v5, %v5258_v56 }
 0xc6a   : > { %3609 = vxpose.xlu1.b32.start.end [1/1] (short) (narrow) %v5280_v9, 8  ;;  %v4060_v9 = vld [vmem:[#allocation6 + $0x18] sm:$0xff]  ;;  %4037 = vst.msk [vmem:[#allocation2 + $0x8] sm:$0xff] %vm276_vm2, %v4033_v38 }
 0xc6b   : > { %v4666_v2 = vpack.c.bf16 %v4060_v9, %v4059_v18 }
 0xcb3   : > { %v4042_v58 = vpop.permute.xlu0 %4041  ;;  %v4046_v61 = vpop.permute.xlu1 %4045 }
 0xcb4   : > { %v4052_v3 = vsel %vm276_vm2, %v3394_v46, %v4042_v58 }
 0xcb5   : > { %v4054_v29 = vsel %vm4053_vm9, %v4052_v3, %v4046_v61 }
 0xcb7   : > { %v4050_v59 = vpop.permute.xlu0 %4049 }
 0xcb8   : > { %v4056_v4 = vsel %vm4055_vm10, %v4054_v29, %v4050_v59 }
 0xce3   : > { %v3943_v60 = vpop.trf.xlu0 }
 0xce4   : > { %4643 = vmatmul.mubr.msk.f32.vlgmr.msra.gmra.mrb[40].mxu0 %vm276_vm2, %v3943_v60 }
 0xcea   : > { %v3625_v0 = vpop.trf.xlu1 }
 0xceb   : > { %4628 = vmatmul.mubr.msk.f32.vlgmr.msra.gmra.mrb[36].mxu1 %vm276_vm2, %v3625_v0 }
 0xcec   : > { %4636 = vmatpush3.msra.mxu1 %v3176_v12  ;;  %4637 = vmatprep.mubr.msk.f32.mxu1 %vm4962_vm1, %v4963_v13 }
 0xced   : > { %4662 = vmatprep.subr.bf16.mxu1 %v4961_v10 }
 0xcef   : > { %4638 = vmatmul.mubr.msk.f32.vlgmr.msra.gmra.mrb[38].mxu1 %vm276_vm2, %v3837_v48 }
 0xcf0   : > { %4664 = vmatpush3.bf16.msra.mxu1 %v4663_v1  ;;  %4653 = vmatprep.mubr.msk.f32.mxu1 %vm4962_vm1, %v4963_v13 }
 0xcf1   : > { %4665 = vmatprep.subr.bf16.mxu1 %v4961_v10 }
 0xcf4   : > { %4667 = vmatpush3.bf16.msra.mxu1 %v4666_v2 }
 0xcf7   : > { %4654 = vmatmul.mubr.msk.f32.vlgmr.msra.gmra.mrb[40].mxu1 %vm282_vm0, %v4056_v4 }
 0xdb7   : > { %v4028_v13 = vpop.f32.mrb[40].mxu0 }
 0xdb8   : > { %v4035_v10 = vadd.f32 %v4028_v13, %v5278_v8  ;;  %v4644_v6 = vpop.f32.mrb[41].mxu0 }
 0xdba   : > { %4039 = vst.msk [vmem:[#allocation2 + $0x18] sm:$0xff] %vm276_vm2, %v4035_v10 }
 0xdbe   : > { %v3710_v7 = vpop.f32.mrb[36].mxu1 }
 0xdbf   : > { %v4032_v14 = vadd.f32 %v3710_v7, %v5255_v54  ;;  %v4629_v16 = vpop.f32.mrb[37].mxu1 }
 0xdc1   : > { %4036 = vst.msk [vmem:[#allocation2] sm:$0xff] %vm276_vm2, %v4032_v14 }
 0xdc2   : > { %v3922_v17 = vpop.f32.mrb[38].mxu1 }
 0xdc3   : > { %v4034_v44 = vadd.f32 %v3922_v17, %v5288_v11  ;;  %v4639_v56 = vpop.f32.mrb[39].mxu1 }
 0xdc5   : > { %4038 = vst.msk [vmem:[#allocation2 + $0x10] sm:$0xff] %vm276_vm2, %v4034_v44 }
 0xdca   : > { %v4130_v8 = vpop.f32.mrb[40].mxu1 }
 0xdcb   : > { %v4134_v20 = vadd.f32 %v4810_v19, %v4130_v8  ;;  %v4655_v21 = vpop.f32.mrb[41].mxu1 }
 0xdcd   : > { %4135 = vst.msk [vmem:[%s271_s28] sm:$0xff] %vm282_vm0, %v4134_v20 }
 0xdce   : > { %4882 = shalt.err (!%p4879_p5)
}
 0xdcf   : > { %s4883_s8 = scalar_lea.hbm %s5658_s6, 128  ;;  %s4887_s14 = scalar_lea.hbm %s5713_s5, 256 }
 0xdd0   : > { %p4884_p9 = scmp.ne.s32.totalorder %s5658_s6, %s4883_s8  ;;  %p4888_p7 = scmp.lt.u32.totalorder %s5658_s6, %s5713_s5 }
 0xdd1   : > { %p4889_p3 = scmp.lt.u32.totalorder %s4887_s14, %s4883_s8  ;;  %p4891_p4 = scmp.lt.u32.totalorder %s4883_s8, %s5658_s6 }
 0xdd2   : > { %p4885_p1 = pnand %p4884_p9, %p5103_p10 }
 0xdd3   : > { %p4890_p13 = por %p4889_p3, %p4888_p7 }
 0xdd4   : > { %p4886_p2 = pneg %p4885_p1 }
 0xdd5   : > { %p4892_p6 = por %p4891_p4, %p4890_p13 }
 0xdd7   : > { %p4893_p8 = pnand %p4892_p6, %p4886_p2 }
 0xdd9   : > { %4896 = shalt.err (!%p4893_p8)
}
 0xdda   : > { %4682 = dma.vmem_to_hbm [thread:$0]  (%p5103_p10), %s5660_s30, 128, %s5658_s6, %s4137_s21  }
 0xddb PF: > { %s4163_s28 = sand.u32 1, %s4935_s18   ;;  %p5731_p12 = scmp.ne.s32.totalorder %s5721_s29, 0 }
 0xddc   : > { %p5732_p11 = scmp.ge.s32.totalorder %s4955_s23, 2  ;;  %s4164_s25 = scalar_lea.sflag [#allocation5], %s4163_s28 }
 0xdde   : > { %p4693_p0 = pnand %p5732_p11, %p5731_p12 }
 0xde0   : > { %4930 = dma.done.wait (!%p4693_p0), %s4164_s25, 128  }
 0xde1   : > { %4932 = vsyncadd (!%p4693_p0), %s4164_s25, 4294967168  ;;  %s22_s23 = sadd.s32 1, %s4955_s23   ;;  %s5733_s18 = smov %s4939_s19 }
 0xde2   : > { %p19_p5 = scmp.ge.s32.totalorder %s22_s23, 4   ;;  %s5734_s19 = smov %s4943_s20 }
 0xde3   : > { %s5735_s20 = smov %s5112_s15  ;;  %s5736_s21 = smov %s4951_s22 }
 0xde4   : > { %s5737_s22 = smov %s5739_s9  ;;  %21 = sbr.rel (!%p19_p5) target bundleno = 7 (0x7), region = 93 }
 0xdeb   :  { %4169 = vsyncpa [#allocation4], 1 }
 0xdec   :  { %4171 = vsyncpa [#allocation4 + $0x1], 1 }
 0xded   :  { %4172 = vsyncpa [#allocation7], 1 }
 0xdee   :  { %4173 = vsyncpa [#allocation5], 1 }
 0xdef   :  { %4175 = vsyncpa [#allocation5 + $0x1], 1 }

</bundles_post_ra>
